<compile_context>
chip_gen: v6e
topology: v6e:2x2x1
jax: 0.10.0
libtpu: 0.0.40
codegen_flags: <defaults>
</compile_context>

<pallas_src>
import functools

import jax
import jax.numpy as jnp
import numpy as np
from jax.experimental import pallas as pl
from jax.experimental.pallas import tpu as pltpu

TIME_STEPS = 24
RECURRENT_MAX = 2.0 ** (1.0 / TIME_STEPS)
RECURRENT_MIN = 0.5 ** (1.0 / TIME_STEPS)

INPUT_SIZE = 16
HIDDEN = 32          # layer_sizes = [32, 32]
OUT = 18             # nn.Linear(layer_sizes[-1], 18)


def net_kernel(x_ref, w1_ref, uw_ref, b1_ref, u2_ref, b2_ref, wl_ref, bl_ref,
               out_ref, gx_ref, *, T, B, H):
    """2-layer LSTM recurrence over T steps + Linear on the last step (single invocation).

    x_ref  : (T*B, D)  bf16, time-major, batch padded to a sublane multiple
    w1_ref : (D, 4H)   bf16, i/f/o gate columns pre-scaled by 0.5
    uw_ref : (H, 8H)   bf16, fused [U1 | W2] (i/f/o columns pre-scaled)
    b1_ref : (1, 4H)   f32 pre-scaled;  u2_ref: (H, 4H) bf16 pre-scaled; b2_ref: (1, 4H) f32
    wl_ref : (H, OUT)  bf16;  bl_ref: (1, OUT) f32
    gx_ref : (T*B, 4H) f32 VMEM scratch holding the hoisted input projection x@W1 + b1
    gate lane layout: [i | f | o | c] -> 4H = 128 lanes.
    """
    # Hoisted input projection over ALL time steps: one bf16 MXU matmul, bias folded in.
    gx_ref[...] = (jnp.dot(x_ref[...], w1_ref[...],
                           preferred_element_type=jnp.float32) + b1_ref[...])

    # Loop-invariant weights / biases (broadcasts hoisted out of the unrolled loop).
    uw = uw_ref[...]
    u2 = u2_ref[...]
    b2 = jnp.broadcast_to(b2_ref[...], (B, 4 * H))

    def gate_act(gates, c):
        # ONE full-width (4H = 128 lane) EUP pass.  i/f/o pre-activations were pre-scaled by
        # 0.5 in the weights/bias, so sigmoid(z) = 0.5*tanh(z/2)+0.5; c gate is tanh(z) as-is.
        th = jnp.tanh(gates)
        sig = 0.5 * th + 0.5
        i = sig[:, 0 * H:1 * H]
        f = sig[:, 1 * H:2 * H]
        o = sig[:, 2 * H:3 * H]
        g = th[:, 3 * H:4 * H]
        c_new = f * c + i * g
        h_new = o * jnp.tanh(c_new)
        return h_new, c_new

    z = jnp.zeros((B, H), jnp.float32)

    # Prologue: layer 0, step 0 (zero initial state => recurrent term vanishes).
    h1, c1 = gate_act(gx_ref[pl.ds(0, B), :], z)
    h2, c2 = z, z

    # Skewed steady state: iteration t issues layer0(t) and layer1(t-1); both depend only on
    # the carried h1(t-1), so their dots/EUP work can overlap and share one fused MXU push.
    def step(t, carry):
        h1, c1, h2, c2 = carry                     # h1 = h1(t-1), h2 = h2(t-2)
        h1b = h1.astype(jnp.bfloat16)
        h2b = h2.astype(jnp.bfloat16)
        hu = jnp.dot(h1b, uw, preferred_element_type=jnp.float32)   # (B, 8H): [h1@U1 | h1@W2]
        row = pl.multiple_of(t * B, B)
        gates1 = gx_ref[pl.ds(row, B), :] + hu[:, :4 * H]           # layer 0, step t
        gates2 = (hu[:, 4 * H:]                                     # layer 1, step t-1
                  + jnp.dot(h2b, u2, preferred_element_type=jnp.float32) + b2)
        h1n, c1n = gate_act(gates1, c1)
        h2n, c2n = gate_act(gates2, c2)
        return (h1n, c1n, h2n, c2n)

    h1, c1, h2, c2 = jax.lax.fori_loop(1, T, step, (h1, c1, h2, c2), unroll=True)

    # Epilogue: layer 1, step T-1.
    gates2 = (jnp.dot(h1.astype(jnp.bfloat16), uw[:, 4 * H:],
                      preferred_element_type=jnp.float32)
              + jnp.dot(h2.astype(jnp.bfloat16), u2,
                        preferred_element_type=jnp.float32)
              + b2)
    h2, _ = gate_act(gates2, c2)

    # Final Linear on the last time step only: lin(y[:, -1]).
    out_ref[...] = (jnp.dot(h2.astype(jnp.bfloat16), wl_ref[...],
                            preferred_element_type=jnp.float32)
                    + bl_ref[...]).astype(out_ref.dtype)


def _prepare_params(params, H):
    """Fold the sigmoid->tanh 0.5 prescale into the i/f/o gate columns of W, U AND b for both
    layers, fuse [U1 | W2] along lanes, and cast all matmul operands to bf16 (biases stay f32)."""
    w1, u1, b1, w2, u2, b2, wl, bl = params
    scale = jnp.concatenate([jnp.full((3 * H,), 0.5, jnp.float32),
                             jnp.ones((H,), jnp.float32)])           # per gate column [i|f|o|c]
    w1s = (w1 * scale).astype(jnp.bfloat16)
    b1s = b1 * scale
    b2s = b2 * scale
    uw = jnp.concatenate([u1 * scale, w2 * scale], axis=1).astype(jnp.bfloat16)  # (H, 8H)
    u2s = (u2 * scale).astype(jnp.bfloat16)
    return w1s, uw, b1s, u2s, b2s, wl.astype(jnp.bfloat16), bl


@jax.jit
def net_forward(x, params):
    """x: (B, T, D) float32 (batch_first, matching PyTorch) -> (B, 18) float32."""
    w1, u1, *_ = params
    out_dim = params[6].shape[1]
    B, T, D = x.shape
    H = u1.shape[0]
    B_pad = max(8, -(-B // 8) * 8)        # pad batch to the 8-row sublane width

    # Keep the whole hoisted projection well inside even v7x's scoped VMEM budget.
    assert T * B_pad * 4 * H * 4 <= 8 * 1024 * 1024, "tile gx over T for this shape"

    x_tbd = jnp.transpose(x, (1, 0, 2))   # (T, B, D): time-major for the recurrence
    if B_pad != B:
        x_tbd = jnp.pad(x_tbd, ((0, 0), (0, B_pad - B), (0, 0)))
    x2d = x_tbd.reshape(T * B_pad, D).astype(jnp.bfloat16)   # flatten: x@W1 is one big matmul

    w1s, uw, b1s, u2s, b2s, wlb, bl = _prepare_params(params, H)

    vmem_spec = pl.BlockSpec(memory_space=pltpu.MemorySpace.VMEM)
    out = pl.pallas_call(
        functools.partial(net_kernel, T=T, B=B_pad, H=H),
        out_shape=jax.ShapeDtypeStruct((B_pad, out_dim), jnp.float32),
        in_specs=[vmem_spec] * 8,
        out_specs=vmem_spec,
        scratch_shapes=[pltpu.VMEM((T * B_pad, 4 * H), jnp.float32)],
    )(x2d, w1s, uw, b1s, u2s, b2s, wlb, bl)
    return out[:B]


def init_params(key, input_size=INPUT_SIZE, hidden=HIDDEN, out=OUT):
    """Deterministic synthetic init mirroring the module's __init__ shapes/ranges."""
    ks = jax.random.split(key, 8)
    # W*: 0.1 * randn per gate (stacked [i|f|o|c])
    w1 = 0.1 * jax.random.normal(ks[0], (input_size, 4 * hidden), jnp.float32)
    w2 = 0.1 * jax.random.normal(ks[1], (hidden, 4 * hidden), jnp.float32)
    # recurrent U*: layer 0 uniform(0, RECURRENT_MAX); last layer uniform(RECURRENT_MIN, RECURRENT_MAX)
    u1 = jax.random.uniform(ks[2], (hidden, 4 * hidden), jnp.float32,
                            minval=0.0, maxval=RECURRENT_MAX)
    u2 = jax.random.uniform(ks[3], (hidden, 4 * hidden), jnp.float32,
                            minval=RECURRENT_MIN, maxval=RECURRENT_MAX)
    # cell biases initialized to ones in myLSTMCell
    b1 = jnp.ones((1, 4 * hidden), jnp.float32)
    b2 = jnp.ones((1, 4 * hidden), jnp.float32)
    # self.lin: weight ~ N(0, 0.01), bias = 0.1  (stored as (H, out) for y = h @ Wl + bl)
    wl = 0.01 * jax.random.normal(ks[4], (hidden, out), jnp.float32)
    bl = jnp.full((1, out), 0.1, jnp.float32)
    return (w1, u1, b1, w2, u2, b2, wl, bl)


def _ref_lstm_step(x_t, h, c, w, u, b):
    """Standard myLSTMCell math: gates = x@W + h@U + b ; stacked [i|f|o|c]."""
    H = h.shape[-1]
    gates = x_t @ w + h @ u + b
    i = jax.nn.sigmoid(gates[:, 0 * H:1 * H])
    f = jax.nn.sigmoid(gates[:, 1 * H:2 * H])
    o = jax.nn.sigmoid(gates[:, 2 * H:3 * H])
    g = jnp.tanh(gates[:, 3 * H:4 * H])
    c_new = f * c + i * g
    h_new = o * jnp.tanh(c_new)
    return h_new, c_new


def ref_forward(x, params):
    """Pure-JAX reference of the same forward (lax.scan), for validation."""
    w1, u1, b1, w2, u2, b2, wl, bl = params
    B = x.shape[0]
    H = u1.shape[0]

    def step(carry, x_t):
        h1, c1, h2, c2 = carry
        h1, c1 = _ref_lstm_step(x_t, h1, c1, w1, u1, b1)
        h2, c2 = _ref_lstm_step(h1, h2, c2, w2, u2, b2)
        return (h1, c1, h2, c2), h2

    init = tuple(jnp.zeros((B, H), jnp.float32) for _ in range(4))
    _, ys = jax.lax.scan(step, init, jnp.transpose(x, (1, 0, 2)))
    return ys[-1] @ wl + bl   # (B, 18); .squeeze(1) in torch is a no-op here


if __name__ == "__main__":
    key = jax.random.PRNGKey(0)
    k_x, k_p = jax.random.split(key)

    B, T = 2, 8
    x = jax.random.normal(k_x, (B, T, INPUT_SIZE), jnp.float32)
    params = init_params(k_p)

    out = jax.block_until_ready(net_forward(x, params))
    ref = jax.block_until_ready(ref_forward(x, params))

    assert out.shape == (B, OUT), out.shape
    np.testing.assert_allclose(np.asarray(out), np.asarray(ref), rtol=2e-2, atol=2e-2)
    print("KERNEL_OK")
</pallas_src>

<mosaic_0001>
module attributes {stable_mosaic.version = 11 : i64} {
  func.func @net_kernel(%arg0: memref<64x16xbf16, #tpu.memory_space<vmem>>, %arg1: memref<16x128xbf16, #tpu.memory_space<vmem>>, %arg2: memref<32x256xbf16, #tpu.memory_space<vmem>>, %arg3: memref<1x128xf32, #tpu.memory_space<vmem>>, %arg4: memref<32x128xbf16, #tpu.memory_space<vmem>>, %arg5: memref<1x128xf32, #tpu.memory_space<vmem>>, %arg6: memref<32x18xbf16, #tpu.memory_space<vmem>>, %arg7: memref<1x18xf32, #tpu.memory_space<vmem>>, %arg8: memref<8x18xf32, #tpu.memory_space<vmem>>, %arg9: memref<64x128xf32, #tpu.memory_space<vmem>>) attributes {dimension_semantics = [], scalar_prefetch = 0 : i64, scratch_operands = 1 : i64, tpu.core_type = #tpu.core_type<tc>} {
    %c0 = arith.constant 0 : index
    %c0_0 = arith.constant 0 : index
    %0 = vector.load %arg0[%c0, %c0_0] : memref<64x16xbf16, #tpu.memory_space<vmem>>, vector<64x16xbf16>
    %c0_1 = arith.constant 0 : index
    %c0_2 = arith.constant 0 : index
    %1 = vector.load %arg1[%c0_1, %c0_2] : memref<16x128xbf16, #tpu.memory_space<vmem>>, vector<16x128xbf16>
    %cst = arith.constant dense<0.000000e+00> : vector<64x128xf32>
    %2 = tpu.matmul %0, %1, %cst {dimension_numbers = #tpu.dot_dimension_numbers<[1], [0], [0], [1], [0, 0, 1, 1], [], []>} : vector<64x16xbf16>, vector<16x128xbf16>, vector<64x128xf32> -> vector<64x128xf32>
    %c0_3 = arith.constant 0 : index
    %c0_4 = arith.constant 0 : index
    %3 = vector.load %arg3[%c0_3, %c0_4] : memref<1x128xf32, #tpu.memory_space<vmem>>, vector<1x128xf32>
    %4 = vector.broadcast %3 : vector<1x128xf32> to vector<64x128xf32>
    %5 = arith.addf %2, %4 : vector<64x128xf32>
    %c0_5 = arith.constant 0 : index
    %c0_6 = arith.constant 0 : index
    %6 = vector.load %arg9[%c0_5, %c0_6] : memref<64x128xf32, #tpu.memory_space<vmem>>, vector<64x128xf32>
    tpu.vector_store %arg9[%c0_5, %c0_6], %5 {strides = array<i32>} : memref<64x128xf32, #tpu.memory_space<vmem>>, vector<64x128xf32>,
    %c0_7 = arith.constant 0 : index
    %c0_8 = arith.constant 0 : index
    %7 = vector.load %arg2[%c0_7, %c0_8] : memref<32x256xbf16, #tpu.memory_space<vmem>>, vector<32x256xbf16>
    %c0_9 = arith.constant 0 : index
    %c0_10 = arith.constant 0 : index
    %8 = vector.load %arg4[%c0_9, %c0_10] : memref<32x128xbf16, #tpu.memory_space<vmem>>, vector<32x128xbf16>
    %c0_11 = arith.constant 0 : index
    %c0_12 = arith.constant 0 : index
    %9 = vector.load %arg5[%c0_11, %c0_12] : memref<1x128xf32, #tpu.memory_space<vmem>>, vector<1x128xf32>
    %10 = vector.shape_cast %9 : vector<1x128xf32> to vector<1x128xf32>
    %11 = vector.broadcast %10 : vector<1x128xf32> to vector<8x128xf32>
    %cst_13 = arith.constant 0.000000e+00 : f32
    %12 = vector.broadcast %cst_13 : f32 to vector<8x32xf32>
    %c0_14 = arith.constant 0 : index
    %c0_15 = arith.constant 0 : index
    %13 = vector.load %arg9[%c0_14, %c0_15] : memref<64x128xf32, #tpu.memory_space<vmem>>, vector<8x128xf32>
    %14 = math.tanh %13 : vector<8x128xf32>
    %cst_16 = arith.constant 5.000000e-01 : f32
    %15 = vector.broadcast %cst_16 : f32 to vector<8x128xf32>
    %16 = arith.mulf %15, %14 : vector<8x128xf32>
    %cst_17 = arith.constant 5.000000e-01 : f32
    %17 = vector.broadcast %cst_17 : f32 to vector<8x128xf32>
    %18 = arith.addf %16, %17 : vector<8x128xf32>
    %19 = vector.extract_strided_slice %18 {offsets = [0, 0], sizes = [8, 32], strides = [1, 1]} : vector<8x128xf32> to vector<8x32xf32>
    %20 = vector.extract_strided_slice %18 {offsets = [0, 32], sizes = [8, 32], strides = [1, 1]} : vector<8x128xf32> to vector<8x32xf32>
    %21 = vector.extract_strided_slice %18 {offsets = [0, 64], sizes = [8, 32], strides = [1, 1]} : vector<8x128xf32> to vector<8x32xf32>
    %22 = vector.extract_strided_slice %14 {offsets = [0, 96], sizes = [8, 32], strides = [1, 1]} : vector<8x128xf32> to vector<8x32xf32>
    %23 = arith.mulf %20, %12 : vector<8x32xf32>
    %24 = arith.mulf %19, %22 : vector<8x32xf32>
    %25 = arith.addf %23, %24 : vector<8x32xf32>
    %26 = math.tanh %25 : vector<8x32xf32>
    %27 = arith.mulf %21, %26 : vector<8x32xf32>
    %c1_i32 = arith.constant 1 : i32
    %28 = arith.truncf %27 : vector<8x32xf32> to vector<8x32xbf16>
    %29 = arith.truncf %12 : vector<8x32xf32> to vector<8x32xbf16>
    %cst_18 = arith.constant dense<0.000000e+00> : vector<8x256xf32>
    %30 = tpu.matmul %28, %7, %cst_18 {dimension_numbers = #tpu.dot_dimension_numbers<[1], [0], [0], [1], [0, 0, 1, 1], [], []>} : vector<8x32xbf16>, vector<32x256xbf16>, vector<8x256xf32> -> vector<8x256xf32>
    %c8_i32 = arith.constant 8 : i32
    %31 = arith.muli %c1_i32, %c8_i32 : i32
    %32 = tpu.assume_multiple %31, 8 : i32
    %33 = arith.index_cast %32 : i32 to index
    %c0_19 = arith.constant 0 : index
    %34 = vector.load %arg9[%33, %c0_19] : memref<64x128xf32, #tpu.memory_space<vmem>>, vector<8x128xf32>
    %35 = vector.extract_strided_slice %30 {offsets = [0, 0], sizes = [8, 128], strides = [1, 1]} : vector<8x256xf32> to vector<8x128xf32>
    %36 = arith.addf %34, %35 : vector<8x128xf32>
    %37 = vector.extract_strided_slice %30 {offsets = [0, 128], sizes = [8, 128], strides = [1, 1]} : vector<8x256xf32> to vector<8x128xf32>
    %cst_20 = arith.constant dense<0.000000e+00> : vector<8x128xf32>
    %38 = tpu.matmul %29, %8, %cst_20 {dimension_numbers = #tpu.dot_dimension_numbers<[1], [0], [0], [1], [0, 0, 1, 1], [], []>} : vector<8x32xbf16>, vector<32x128xbf16>, vector<8x128xf32> -> vector<8x128xf32>
    %39 = arith.addf %37, %38 : vector<8x128xf32>
    %40 = arith.addf %39, %11 : vector<8x128xf32>
    %41 = math.tanh %36 : vector<8x128xf32>
    %cst_21 = arith.constant 5.000000e-01 : f32
    %42 = vector.broadcast %cst_21 : f32 to vector<8x128xf32>
    %43 = arith.mulf %42, %41 : vector<8x128xf32>
    %cst_22 = arith.constant 5.000000e-01 : f32
    %44 = vector.broadcast %cst_22 : f32 to vector<8x128xf32>
    %45 = arith.addf %43, %44 : vector<8x128xf32>
    %46 = vector.extract_strided_slice %45 {offsets = [0, 0], sizes = [8, 32], strides = [1, 1]} : vector<8x128xf32> to vector<8x32xf32>
    %47 = vector.extract_strided_slice %45 {offsets = [0, 32], sizes = [8, 32], strides = [1, 1]} : vector<8x128xf32> to vector<8x32xf32>
    %48 = vector.extract_strided_slice %45 {offsets = [0, 64], sizes = [8, 32], strides = [1, 1]} : vector<8x128xf32> to vector<8x32xf32>
    %49 = vector.extract_strided_slice %41 {offsets = [0, 96], sizes = [8, 32], strides = [1, 1]} : vector<8x128xf32> to vector<8x32xf32>
    %50 = arith.mulf %47, %25 : vector<8x32xf32>
    %51 = arith.mulf %46, %49 : vector<8x32xf32>
    %52 = arith.addf %50, %51 : vector<8x32xf32>
    %53 = math.tanh %52 : vector<8x32xf32>
    %54 = arith.mulf %48, %53 : vector<8x32xf32>
    %55 = math.tanh %40 : vector<8x128xf32>
    %cst_23 = arith.constant 5.000000e-01 : f32
    %56 = vector.broadcast %cst_23 : f32 to vector<8x128xf32>
    %57 = arith.mulf %56, %55 : vector<8x128xf32>
    %cst_24 = arith.constant 5.000000e-01 : f32
    %58 = vector.broadcast %cst_24 : f32 to vector<8x128xf32>
    %59 = arith.addf %57, %58 : vector<8x128xf32>
    %60 = vector.extract_strided_slice %59 {offsets = [0, 0], sizes = [8, 32], strides = [1, 1]} : vector<8x128xf32> to vector<8x32xf32>
    %61 = vector.extract_strided_slice %59 {offsets = [0, 32], sizes = [8, 32], strides = [1, 1]} : vector<8x128xf32> to vector<8x32xf32>
    %62 = vector.extract_strided_slice %59 {offsets = [0, 64], sizes = [8, 32], strides = [1, 1]} : vector<8x128xf32> to vector<8x32xf32>
    %63 = vector.extract_strided_slice %55 {offsets = [0, 96], sizes = [8, 32], strides = [1, 1]} : vector<8x128xf32> to vector<8x32xf32>
    %64 = arith.mulf %61, %12 : vector<8x32xf32>
    %65 = arith.mulf %60, %63 : vector<8x32xf32>
    %66 = arith.addf %64, %65 : vector<8x32xf32>
    %67 = math.tanh %66 : vector<8x32xf32>
    %68 = arith.mulf %62, %67 : vector<8x32xf32>
    %c2_i32 = arith.constant 2 : i32
    %69 = arith.truncf %54 : vector<8x32xf32> to vector<8x32xbf16>
    %70 = arith.truncf %68 : vector<8x32xf32> to vector<8x32xbf16>
    %cst_25 = arith.constant dense<0.000000e+00> : vector<8x256xf32>
    %71 = tpu.matmul %69, %7, %cst_25 {dimension_numbers = #tpu.dot_dimension_numbers<[1], [0], [0], [1], [0, 0, 1, 1], [], []>} : vector<8x32xbf16>, vector<32x256xbf16>, vector<8x256xf32> -> vector<8x256xf32>
    %c8_i32_26 = arith.constant 8 : i32
    %72 = arith.muli %c2_i32, %c8_i32_26 : i32
    %73 = tpu.assume_multiple %72, 8 : i32
    %74 = arith.index_cast %73 : i32 to index
    %c0_27 = arith.constant 0 : index
    %75 = vector.load %arg9[%74, %c0_27] : memref<64x128xf32, #tpu.memory_space<vmem>>, vector<8x128xf32>
    %76 = vector.extract_strided_slice %71 {offsets = [0, 0], sizes = [8, 128], strides = [1, 1]} : vector<8x256xf32> to vector<8x128xf32>
    %77 = arith.addf %75, %76 : vector<8x128xf32>
    %78 = vector.extract_strided_slice %71 {offsets = [0, 128], sizes = [8, 128], strides = [1, 1]} : vector<8x256xf32> to vector<8x128xf32>
    %cst_28 = arith.constant dense<0.000000e+00> : vector<8x128xf32>
    %79 = tpu.matmul %70, %8, %cst_28 {dimension_numbers = #tpu.dot_dimension_numbers<[1], [0], [0], [1], [0, 0, 1, 1], [], []>} : vector<8x32xbf16>, vector<32x128xbf16>, vector<8x128xf32> -> vector<8x128xf32>
    %80 = arith.addf %78, %79 : vector<8x128xf32>
    %81 = arith.addf %80, %11 : vector<8x128xf32>
    %82 = math.tanh %77 : vector<8x128xf32>
    %cst_29 = arith.constant 5.000000e-01 : f32
    %83 = vector.broadcast %cst_29 : f32 to vector<8x128xf32>
    %84 = arith.mulf %83, %82 : vector<8x128xf32>
    %cst_30 = arith.constant 5.000000e-01 : f32
    %85 = vector.broadcast %cst_30 : f32 to vector<8x128xf32>
    %86 = arith.addf %84, %85 : vector<8x128xf32>
    %87 = vector.extract_strided_slice %86 {offsets = [0, 0], sizes = [8, 32], strides = [1, 1]} : vector<8x128xf32> to vector<8x32xf32>
    %88 = vector.extract_strided_slice %86 {offsets = [0, 32], sizes = [8, 32], strides = [1, 1]} : vector<8x128xf32> to vector<8x32xf32>
    %89 = vector.extract_strided_slice %86 {offsets = [0, 64], sizes = [8, 32], strides = [1, 1]} : vector<8x128xf32> to vector<8x32xf32>
    %90 = vector.extract_strided_slice %82 {offsets = [0, 96], sizes = [8, 32], strides = [1, 1]} : vector<8x128xf32> to vector<8x32xf32>
    %91 = arith.mulf %88, %52 : vector<8x32xf32>
    %92 = arith.mulf %87, %90 : vector<8x32xf32>
    %93 = arith.addf %91, %92 : vector<8x32xf32>
    %94 = math.tanh %93 : vector<8x32xf32>
    %95 = arith.mulf %89, %94 : vector<8x32xf32>
    %96 = math.tanh %81 : vector<8x128xf32>
    %cst_31 = arith.constant 5.000000e-01 : f32
    %97 = vector.broadcast %cst_31 : f32 to vector<8x128xf32>
    %98 = arith.mulf %97, %96 : vector<8x128xf32>
    %cst_32 = arith.constant 5.000000e-01 : f32
    %99 = vector.broadcast %cst_32 : f32 to vector<8x128xf32>
    %100 = arith.addf %98, %99 : vector<8x128xf32>
    %101 = vector.extract_strided_slice %100 {offsets = [0, 0], sizes = [8, 32], strides = [1, 1]} : vector<8x128xf32> to vector<8x32xf32>
    %102 = vector.extract_strided_slice %100 {offsets = [0, 32], sizes = [8, 32], strides = [1, 1]} : vector<8x128xf32> to vector<8x32xf32>
    %103 = vector.extract_strided_slice %100 {offsets = [0, 64], sizes = [8, 32], strides = [1, 1]} : vector<8x128xf32> to vector<8x32xf32>
    %104 = vector.extract_strided_slice %96 {offsets = [0, 96], sizes = [8, 32], strides = [1, 1]} : vector<8x128xf32> to vector<8x32xf32>
    %105 = arith.mulf %102, %66 : vector<8x32xf32>
    %106 = arith.mulf %101, %104 : vector<8x32xf32>
    %107 = arith.addf %105, %106 : vector<8x32xf32>
    %108 = math.tanh %107 : vector<8x32xf32>
    %109 = arith.mulf %103, %108 : vector<8x32xf32>
    %c3_i32 = arith.constant 3 : i32
    %110 = arith.truncf %95 : vector<8x32xf32> to vector<8x32xbf16>
    %111 = arith.truncf %109 : vector<8x32xf32> to vector<8x32xbf16>
    %cst_33 = arith.constant dense<0.000000e+00> : vector<8x256xf32>
    %112 = tpu.matmul %110, %7, %cst_33 {dimension_numbers = #tpu.dot_dimension_numbers<[1], [0], [0], [1], [0, 0, 1, 1], [], []>} : vector<8x32xbf16>, vector<32x256xbf16>, vector<8x256xf32> -> vector<8x256xf32>
    %c8_i32_34 = arith.constant 8 : i32
    %113 = arith.muli %c3_i32, %c8_i32_34 : i32
    %114 = tpu.assume_multiple %113, 8 : i32
    %115 = arith.index_cast %114 : i32 to index
    %c0_35 = arith.constant 0 : index
    %116 = vector.load %arg9[%115, %c0_35] : memref<64x128xf32, #tpu.memory_space<vmem>>, vector<8x128xf32>
    %117 = vector.extract_strided_slice %112 {offsets = [0, 0], sizes = [8, 128], strides = [1, 1]} : vector<8x256xf32> to vector<8x128xf32>
    %118 = arith.addf %116, %117 : vector<8x128xf32>
    %119 = vector.extract_strided_slice %112 {offsets = [0, 128], sizes = [8, 128], strides = [1, 1]} : vector<8x256xf32> to vector<8x128xf32>
    %cst_36 = arith.constant dense<0.000000e+00> : vector<8x128xf32>
    %120 = tpu.matmul %111, %8, %cst_36 {dimension_numbers = #tpu.dot_dimension_numbers<[1], [0], [0], [1], [0, 0, 1, 1], [], []>} : vector<8x32xbf16>, vector<32x128xbf16>, vector<8x128xf32> -> vector<8x128xf32>
    %121 = arith.addf %119, %120 : vector<8x128xf32>
    %122 = arith.addf %121, %11 : vector<8x128xf32>
    %123 = math.tanh %118 : vector<8x128xf32>
    %cst_37 = arith.constant 5.000000e-01 : f32
    %124 = vector.broadcast %cst_37 : f32 to vector<8x128xf32>
    %125 = arith.mulf %124, %123 : vector<8x128xf32>
    %cst_38 = arith.constant 5.000000e-01 : f32
    %126 = vector.broadcast %cst_38 : f32 to vector<8x128xf32>
    %127 = arith.addf %125, %126 : vector<8x128xf32>
    %128 = vector.extract_strided_slice %127 {offsets = [0, 0], sizes = [8, 32], strides = [1, 1]} : vector<8x128xf32> to vector<8x32xf32>
    %129 = vector.extract_strided_slice %127 {offsets = [0, 32], sizes = [8, 32], strides = [1, 1]} : vector<8x128xf32> to vector<8x32xf32>
    %130 = vector.extract_strided_slice %127 {offsets = [0, 64], sizes = [8, 32], strides = [1, 1]} : vector<8x128xf32> to vector<8x32xf32>
    %131 = vector.extract_strided_slice %123 {offsets = [0, 96], sizes = [8, 32], strides = [1, 1]} : vector<8x128xf32> to vector<8x32xf32>
    %132 = arith.mulf %129, %93 : vector<8x32xf32>
    %133 = arith.mulf %128, %131 : vector<8x32xf32>
    %134 = arith.addf %132, %133 : vector<8x32xf32>
    %135 = math.tanh %134 : vector<8x32xf32>
    %136 = arith.mulf %130, %135 : vector<8x32xf32>
    %137 = math.tanh %122 : vector<8x128xf32>
    %cst_39 = arith.constant 5.000000e-01 : f32
    %138 = vector.broadcast %cst_39 : f32 to vector<8x128xf32>
    %139 = arith.mulf %138, %137 : vector<8x128xf32>
    %cst_40 = arith.constant 5.000000e-01 : f32
    %140 = vector.broadcast %cst_40 : f32 to vector<8x128xf32>
    %141 = arith.addf %139, %140 : vector<8x128xf32>
    %142 = vector.extract_strided_slice %141 {offsets = [0, 0], sizes = [8, 32], strides = [1, 1]} : vector<8x128xf32> to vector<8x32xf32>
    %143 = vector.extract_strided_slice %141 {offsets = [0, 32], sizes = [8, 32], strides = [1, 1]} : vector<8x128xf32> to vector<8x32xf32>
    %144 = vector.extract_strided_slice %141 {offsets = [0, 64], sizes = [8, 32], strides = [1, 1]} : vector<8x128xf32> to vector<8x32xf32>
    %145 = vector.extract_strided_slice %137 {offsets = [0, 96], sizes = [8, 32], strides = [1, 1]} : vector<8x128xf32> to vector<8x32xf32>
    %146 = arith.mulf %143, %107 : vector<8x32xf32>
    %147 = arith.mulf %142, %145 : vector<8x32xf32>
    %148 = arith.addf %146, %147 : vector<8x32xf32>
    %149 = math.tanh %148 : vector<8x32xf32>
    %150 = arith.mulf %144, %149 : vector<8x32xf32>
    %c4_i32 = arith.constant 4 : i32
    %151 = arith.truncf %136 : vector<8x32xf32> to vector<8x32xbf16>
    %152 = arith.truncf %150 : vector<8x32xf32> to vector<8x32xbf16>
    %cst_41 = arith.constant dense<0.000000e+00> : vector<8x256xf32>
    %153 = tpu.matmul %151, %7, %cst_41 {dimension_numbers = #tpu.dot_dimension_numbers<[1], [0], [0], [1], [0, 0, 1, 1], [], []>} : vector<8x32xbf16>, vector<32x256xbf16>, vector<8x256xf32> -> vector<8x256xf32>
    %c8_i32_42 = arith.constant 8 : i32
    %154 = arith.muli %c4_i32, %c8_i32_42 : i32
    %155 = tpu.assume_multiple %154, 8 : i32
    %156 = arith.index_cast %155 : i32 to index
    %c0_43 = arith.constant 0 : index
    %157 = vector.load %arg9[%156, %c0_43] : memref<64x128xf32, #tpu.memory_space<vmem>>, vector<8x128xf32>
    %158 = vector.extract_strided_slice %153 {offsets = [0, 0], sizes = [8, 128], strides = [1, 1]} : vector<8x256xf32> to vector<8x128xf32>
    %159 = arith.addf %157, %158 : vector<8x128xf32>
    %160 = vector.extract_strided_slice %153 {offsets = [0, 128], sizes = [8, 128], strides = [1, 1]} : vector<8x256xf32> to vector<8x128xf32>
    %cst_44 = arith.constant dense<0.000000e+00> : vector<8x128xf32>
    %161 = tpu.matmul %152, %8, %cst_44 {dimension_numbers = #tpu.dot_dimension_numbers<[1], [0], [0], [1], [0, 0, 1, 1], [], []>} : vector<8x32xbf16>, vector<32x128xbf16>, vector<8x128xf32> -> vector<8x128xf32>
    %162 = arith.addf %160, %161 : vector<8x128xf32>
    %163 = arith.addf %162, %11 : vector<8x128xf32>
    %164 = math.tanh %159 : vector<8x128xf32>
    %cst_45 = arith.constant 5.000000e-01 : f32
    %165 = vector.broadcast %cst_45 : f32 to vector<8x128xf32>
    %166 = arith.mulf %165, %164 : vector<8x128xf32>
    %cst_46 = arith.constant 5.000000e-01 : f32
    %167 = vector.broadcast %cst_46 : f32 to vector<8x128xf32>
    %168 = arith.addf %166, %167 : vector<8x128xf32>
    %169 = vector.extract_strided_slice %168 {offsets = [0, 0], sizes = [8, 32], strides = [1, 1]} : vector<8x128xf32> to vector<8x32xf32>
    %170 = vector.extract_strided_slice %168 {offsets = [0, 32], sizes = [8, 32], strides = [1, 1]} : vector<8x128xf32> to vector<8x32xf32>
    %171 = vector.extract_strided_slice %168 {offsets = [0, 64], sizes = [8, 32], strides = [1, 1]} : vector<8x128xf32> to vector<8x32xf32>
    %172 = vector.extract_strided_slice %164 {offsets = [0, 96], sizes = [8, 32], strides = [1, 1]} : vector<8x128xf32> to vector<8x32xf32>
    %173 = arith.mulf %170, %134 : vector<8x32xf32>
    %174 = arith.mulf %169, %172 : vector<8x32xf32>
    %175 = arith.addf %173, %174 : vector<8x32xf32>
    %176 = math.tanh %175 : vector<8x32xf32>
    %177 = arith.mulf %171, %176 : vector<8x32xf32>
    %178 = math.tanh %163 : vector<8x128xf32>
    %cst_47 = arith.constant 5.000000e-01 : f32
    %179 = vector.broadcast %cst_47 : f32 to vector<8x128xf32>
    %180 = arith.mulf %179, %178 : vector<8x128xf32>
    %cst_48 = arith.constant 5.000000e-01 : f32
    %181 = vector.broadcast %cst_48 : f32 to vector<8x128xf32>
    %182 = arith.addf %180, %181 : vector<8x128xf32>
    %183 = vector.extract_strided_slice %182 {offsets = [0, 0], sizes = [8, 32], strides = [1, 1]} : vector<8x128xf32> to vector<8x32xf32>
    %184 = vector.extract_strided_slice %182 {offsets = [0, 32], sizes = [8, 32], strides = [1, 1]} : vector<8x128xf32> to vector<8x32xf32>
    %185 = vector.extract_strided_slice %182 {offsets = [0, 64], sizes = [8, 32], strides = [1, 1]} : vector<8x128xf32> to vector<8x32xf32>
    %186 = vector.extract_strided_slice %178 {offsets = [0, 96], sizes = [8, 32], strides = [1, 1]} : vector<8x128xf32> to vector<8x32xf32>
    %187 = arith.mulf %184, %148 : vector<8x32xf32>
    %188 = arith.mulf %183, %186 : vector<8x32xf32>
    %189 = arith.addf %187, %188 : vector<8x32xf32>
    %190 = math.tanh %189 : vector<8x32xf32>
    %191 = arith.mulf %185, %190 : vector<8x32xf32>
    %c5_i32 = arith.constant 5 : i32
    %192 = arith.truncf %177 : vector<8x32xf32> to vector<8x32xbf16>
    %193 = arith.truncf %191 : vector<8x32xf32> to vector<8x32xbf16>
    %cst_49 = arith.constant dense<0.000000e+00> : vector<8x256xf32>
    %194 = tpu.matmul %192, %7, %cst_49 {dimension_numbers = #tpu.dot_dimension_numbers<[1], [0], [0], [1], [0, 0, 1, 1], [], []>} : vector<8x32xbf16>, vector<32x256xbf16>, vector<8x256xf32> -> vector<8x256xf32>
    %c8_i32_50 = arith.constant 8 : i32
    %195 = arith.muli %c5_i32, %c8_i32_50 : i32
    %196 = tpu.assume_multiple %195, 8 : i32
    %197 = arith.index_cast %196 : i32 to index
    %c0_51 = arith.constant 0 : index
    %198 = vector.load %arg9[%197, %c0_51] : memref<64x128xf32, #tpu.memory_space<vmem>>, vector<8x128xf32>
    %199 = vector.extract_strided_slice %194 {offsets = [0, 0], sizes = [8, 128], strides = [1, 1]} : vector<8x256xf32> to vector<8x128xf32>
    %200 = arith.addf %198, %199 : vector<8x128xf32>
    %201 = vector.extract_strided_slice %194 {offsets = [0, 128], sizes = [8, 128], strides = [1, 1]} : vector<8x256xf32> to vector<8x128xf32>
    %cst_52 = arith.constant dense<0.000000e+00> : vector<8x128xf32>
    %202 = tpu.matmul %193, %8, %cst_52 {dimension_numbers = #tpu.dot_dimension_numbers<[1], [0], [0], [1], [0, 0, 1, 1], [], []>} : vector<8x32xbf16>, vector<32x128xbf16>, vector<8x128xf32> -> vector<8x128xf32>
    %203 = arith.addf %201, %202 : vector<8x128xf32>
    %204 = arith.addf %203, %11 : vector<8x128xf32>
    %205 = math.tanh %200 : vector<8x128xf32>
    %cst_53 = arith.constant 5.000000e-01 : f32
    %206 = vector.broadcast %cst_53 : f32 to vector<8x128xf32>
    %207 = arith.mulf %206, %205 : vector<8x128xf32>
    %cst_54 = arith.constant 5.000000e-01 : f32
    %208 = vector.broadcast %cst_54 : f32 to vector<8x128xf32>
    %209 = arith.addf %207, %208 : vector<8x128xf32>
    %210 = vector.extract_strided_slice %209 {offsets = [0, 0], sizes = [8, 32], strides = [1, 1]} : vector<8x128xf32> to vector<8x32xf32>
    %211 = vector.extract_strided_slice %209 {offsets = [0, 32], sizes = [8, 32], strides = [1, 1]} : vector<8x128xf32> to vector<8x32xf32>
    %212 = vector.extract_strided_slice %209 {offsets = [0, 64], sizes = [8, 32], strides = [1, 1]} : vector<8x128xf32> to vector<8x32xf32>
    %213 = vector.extract_strided_slice %205 {offsets = [0, 96], sizes = [8, 32], strides = [1, 1]} : vector<8x128xf32> to vector<8x32xf32>
    %214 = arith.mulf %211, %175 : vector<8x32xf32>
    %215 = arith.mulf %210, %213 : vector<8x32xf32>
    %216 = arith.addf %214, %215 : vector<8x32xf32>
    %217 = math.tanh %216 : vector<8x32xf32>
    %218 = arith.mulf %212, %217 : vector<8x32xf32>
    %219 = math.tanh %204 : vector<8x128xf32>
    %cst_55 = arith.constant 5.000000e-01 : f32
    %220 = vector.broadcast %cst_55 : f32 to vector<8x128xf32>
    %221 = arith.mulf %220, %219 : vector<8x128xf32>
    %cst_56 = arith.constant 5.000000e-01 : f32
    %222 = vector.broadcast %cst_56 : f32 to vector<8x128xf32>
    %223 = arith.addf %221, %222 : vector<8x128xf32>
    %224 = vector.extract_strided_slice %223 {offsets = [0, 0], sizes = [8, 32], strides = [1, 1]} : vector<8x128xf32> to vector<8x32xf32>
    %225 = vector.extract_strided_slice %223 {offsets = [0, 32], sizes = [8, 32], strides = [1, 1]} : vector<8x128xf32> to vector<8x32xf32>
    %226 = vector.extract_strided_slice %223 {offsets = [0, 64], sizes = [8, 32], strides = [1, 1]} : vector<8x128xf32> to vector<8x32xf32>
    %227 = vector.extract_strided_slice %219 {offsets = [0, 96], sizes = [8, 32], strides = [1, 1]} : vector<8x128xf32> to vector<8x32xf32>
    %228 = arith.mulf %225, %189 : vector<8x32xf32>
    %229 = arith.mulf %224, %227 : vector<8x32xf32>
    %230 = arith.addf %228, %229 : vector<8x32xf32>
    %231 = math.tanh %230 : vector<8x32xf32>
    %232 = arith.mulf %226, %231 : vector<8x32xf32>
    %c6_i32 = arith.constant 6 : i32
    %233 = arith.truncf %218 : vector<8x32xf32> to vector<8x32xbf16>
    %234 = arith.truncf %232 : vector<8x32xf32> to vector<8x32xbf16>
    %cst_57 = arith.constant dense<0.000000e+00> : vector<8x256xf32>
    %235 = tpu.matmul %233, %7, %cst_57 {dimension_numbers = #tpu.dot_dimension_numbers<[1], [0], [0], [1], [0, 0, 1, 1], [], []>} : vector<8x32xbf16>, vector<32x256xbf16>, vector<8x256xf32> -> vector<8x256xf32>
    %c8_i32_58 = arith.constant 8 : i32
    %236 = arith.muli %c6_i32, %c8_i32_58 : i32
    %237 = tpu.assume_multiple %236, 8 : i32
    %238 = arith.index_cast %237 : i32 to index
    %c0_59 = arith.constant 0 : index
    %239 = vector.load %arg9[%238, %c0_59] : memref<64x128xf32, #tpu.memory_space<vmem>>, vector<8x128xf32>
    %240 = vector.extract_strided_slice %235 {offsets = [0, 0], sizes = [8, 128], strides = [1, 1]} : vector<8x256xf32> to vector<8x128xf32>
    %241 = arith.addf %239, %240 : vector<8x128xf32>
    %242 = vector.extract_strided_slice %235 {offsets = [0, 128], sizes = [8, 128], strides = [1, 1]} : vector<8x256xf32> to vector<8x128xf32>
    %cst_60 = arith.constant dense<0.000000e+00> : vector<8x128xf32>
    %243 = tpu.matmul %234, %8, %cst_60 {dimension_numbers = #tpu.dot_dimension_numbers<[1], [0], [0], [1], [0, 0, 1, 1], [], []>} : vector<8x32xbf16>, vector<32x128xbf16>, vector<8x128xf32> -> vector<8x128xf32>
    %244 = arith.addf %242, %243 : vector<8x128xf32>
    %245 = arith.addf %244, %11 : vector<8x128xf32>
    %246 = math.tanh %241 : vector<8x128xf32>
    %cst_61 = arith.constant 5.000000e-01 : f32
    %247 = vector.broadcast %cst_61 : f32 to vector<8x128xf32>
    %248 = arith.mulf %247, %246 : vector<8x128xf32>
    %cst_62 = arith.constant 5.000000e-01 : f32
    %249 = vector.broadcast %cst_62 : f32 to vector<8x128xf32>
    %250 = arith.addf %248, %249 : vector<8x128xf32>
    %251 = vector.extract_strided_slice %250 {offsets = [0, 0], sizes = [8, 32], strides = [1, 1]} : vector<8x128xf32> to vector<8x32xf32>
    %252 = vector.extract_strided_slice %250 {offsets = [0, 32], sizes = [8, 32], strides = [1, 1]} : vector<8x128xf32> to vector<8x32xf32>
    %253 = vector.extract_strided_slice %250 {offsets = [0, 64], sizes = [8, 32], strides = [1, 1]} : vector<8x128xf32> to vector<8x32xf32>
    %254 = vector.extract_strided_slice %246 {offsets = [0, 96], sizes = [8, 32], strides = [1, 1]} : vector<8x128xf32> to vector<8x32xf32>
    %255 = arith.mulf %252, %216 : vector<8x32xf32>
    %256 = arith.mulf %251, %254 : vector<8x32xf32>
    %257 = arith.addf %255, %256 : vector<8x32xf32>
    %258 = math.tanh %257 : vector<8x32xf32>
    %259 = arith.mulf %253, %258 : vector<8x32xf32>
    %260 = math.tanh %245 : vector<8x128xf32>
    %cst_63 = arith.constant 5.000000e-01 : f32
    %261 = vector.broadcast %cst_63 : f32 to vector<8x128xf32>
    %262 = arith.mulf %261, %260 : vector<8x128xf32>
    %cst_64 = arith.constant 5.000000e-01 : f32
    %263 = vector.broadcast %cst_64 : f32 to vector<8x128xf32>
    %264 = arith.addf %262, %263 : vector<8x128xf32>
    %265 = vector.extract_strided_slice %264 {offsets = [0, 0], sizes = [8, 32], strides = [1, 1]} : vector<8x128xf32> to vector<8x32xf32>
    %266 = vector.extract_strided_slice %264 {offsets = [0, 32], sizes = [8, 32], strides = [1, 1]} : vector<8x128xf32> to vector<8x32xf32>
    %267 = vector.extract_strided_slice %264 {offsets = [0, 64], sizes = [8, 32], strides = [1, 1]} : vector<8x128xf32> to vector<8x32xf32>
    %268 = vector.extract_strided_slice %260 {offsets = [0, 96], sizes = [8, 32], strides = [1, 1]} : vector<8x128xf32> to vector<8x32xf32>
    %269 = arith.mulf %266, %230 : vector<8x32xf32>
    %270 = arith.mulf %265, %268 : vector<8x32xf32>
    %271 = arith.addf %269, %270 : vector<8x32xf32>
    %272 = math.tanh %271 : vector<8x32xf32>
    %273 = arith.mulf %267, %272 : vector<8x32xf32>
    %c7_i32 = arith.constant 7 : i32
    %274 = arith.truncf %259 : vector<8x32xf32> to vector<8x32xbf16>
    %275 = arith.truncf %273 : vector<8x32xf32> to vector<8x32xbf16>
    %cst_65 = arith.constant dense<0.000000e+00> : vector<8x256xf32>
    %276 = tpu.matmul %274, %7, %cst_65 {dimension_numbers = #tpu.dot_dimension_numbers<[1], [0], [0], [1], [0, 0, 1, 1], [], []>} : vector<8x32xbf16>, vector<32x256xbf16>, vector<8x256xf32> -> vector<8x256xf32>
    %c8_i32_66 = arith.constant 8 : i32
    %277 = arith.muli %c7_i32, %c8_i32_66 : i32
    %278 = tpu.assume_multiple %277, 8 : i32
    %279 = arith.index_cast %278 : i32 to index
    %c0_67 = arith.constant 0 : index
    %280 = vector.load %arg9[%279, %c0_67] : memref<64x128xf32, #tpu.memory_space<vmem>>, vector<8x128xf32>
    %281 = vector.extract_strided_slice %276 {offsets = [0, 0], sizes = [8, 128], strides = [1, 1]} : vector<8x256xf32> to vector<8x128xf32>
    %282 = arith.addf %280, %281 : vector<8x128xf32>
    %283 = vector.extract_strided_slice %276 {offsets = [0, 128], sizes = [8, 128], strides = [1, 1]} : vector<8x256xf32> to vector<8x128xf32>
    %cst_68 = arith.constant dense<0.000000e+00> : vector<8x128xf32>
    %284 = tpu.matmul %275, %8, %cst_68 {dimension_numbers = #tpu.dot_dimension_numbers<[1], [0], [0], [1], [0, 0, 1, 1], [], []>} : vector<8x32xbf16>, vector<32x128xbf16>, vector<8x128xf32> -> vector<8x128xf32>
    %285 = arith.addf %283, %284 : vector<8x128xf32>
    %286 = arith.addf %285, %11 : vector<8x128xf32>
    %287 = math.tanh %282 : vector<8x128xf32>
    %cst_69 = arith.constant 5.000000e-01 : f32
    %288 = vector.broadcast %cst_69 : f32 to vector<8x128xf32>
    %289 = arith.mulf %288, %287 : vector<8x128xf32>
    %cst_70 = arith.constant 5.000000e-01 : f32
    %290 = vector.broadcast %cst_70 : f32 to vector<8x128xf32>
    %291 = arith.addf %289, %290 : vector<8x128xf32>
    %292 = vector.extract_strided_slice %291 {offsets = [0, 0], sizes = [8, 32], strides = [1, 1]} : vector<8x128xf32> to vector<8x32xf32>
    %293 = vector.extract_strided_slice %291 {offsets = [0, 32], sizes = [8, 32], strides = [1, 1]} : vector<8x128xf32> to vector<8x32xf32>
    %294 = vector.extract_strided_slice %291 {offsets = [0, 64], sizes = [8, 32], strides = [1, 1]} : vector<8x128xf32> to vector<8x32xf32>
    %295 = vector.extract_strided_slice %287 {offsets = [0, 96], sizes = [8, 32], strides = [1, 1]} : vector<8x128xf32> to vector<8x32xf32>
    %296 = arith.mulf %293, %257 : vector<8x32xf32>
    %297 = arith.mulf %292, %295 : vector<8x32xf32>
    %298 = arith.addf %296, %297 : vector<8x32xf32>
    %299 = math.tanh %298 : vector<8x32xf32>
    %300 = arith.mulf %294, %299 : vector<8x32xf32>
    %301 = math.tanh %286 : vector<8x128xf32>
    %cst_71 = arith.constant 5.000000e-01 : f32
    %302 = vector.broadcast %cst_71 : f32 to vector<8x128xf32>
    %303 = arith.mulf %302, %301 : vector<8x128xf32>
    %cst_72 = arith.constant 5.000000e-01 : f32
    %304 = vector.broadcast %cst_72 : f32 to vector<8x128xf32>
    %305 = arith.addf %303, %304 : vector<8x128xf32>
    %306 = vector.extract_strided_slice %305 {offsets = [0, 0], sizes = [8, 32], strides = [1, 1]} : vector<8x128xf32> to vector<8x32xf32>
    %307 = vector.extract_strided_slice %305 {offsets = [0, 32], sizes = [8, 32], strides = [1, 1]} : vector<8x128xf32> to vector<8x32xf32>
    %308 = vector.extract_strided_slice %305 {offsets = [0, 64], sizes = [8, 32], strides = [1, 1]} : vector<8x128xf32> to vector<8x32xf32>
    %309 = vector.extract_strided_slice %301 {offsets = [0, 96], sizes = [8, 32], strides = [1, 1]} : vector<8x128xf32> to vector<8x32xf32>
    %310 = arith.mulf %307, %271 : vector<8x32xf32>
    %311 = arith.mulf %306, %309 : vector<8x32xf32>
    %312 = arith.addf %310, %311 : vector<8x32xf32>
    %313 = math.tanh %312 : vector<8x32xf32>
    %314 = arith.mulf %308, %313 : vector<8x32xf32>
    %c7_i32_73 = arith.constant 7 : i32
    %315 = arith.truncf %300 : vector<8x32xf32> to vector<8x32xbf16>
    %316 = vector.extract_strided_slice %7 {offsets = [0, 128], sizes = [32, 128], strides = [1, 1]} : vector<32x256xbf16> to vector<32x128xbf16>
    %cst_74 = arith.constant dense<0.000000e+00> : vector<8x128xf32>
    %317 = tpu.matmul %315, %316, %cst_74 {dimension_numbers = #tpu.dot_dimension_numbers<[1], [0], [0], [1], [0, 0, 1, 1], [], []>} : vector<8x32xbf16>, vector<32x128xbf16>, vector<8x128xf32> -> vector<8x128xf32>
    %318 = arith.truncf %314 : vector<8x32xf32> to vector<8x32xbf16>
    %cst_75 = arith.constant dense<0.000000e+00> : vector<8x128xf32>
    %319 = tpu.matmul %318, %8, %cst_75 {dimension_numbers = #tpu.dot_dimension_numbers<[1], [0], [0], [1], [0, 0, 1, 1], [], []>} : vector<8x32xbf16>, vector<32x128xbf16>, vector<8x128xf32> -> vector<8x128xf32>
    %320 = arith.addf %317, %319 : vector<8x128xf32>
    %321 = arith.addf %320, %11 : vector<8x128xf32>
    %322 = math.tanh %321 : vector<8x128xf32>
    %cst_76 = arith.constant 5.000000e-01 : f32
    %323 = vector.broadcast %cst_76 : f32 to vector<8x128xf32>
    %324 = arith.mulf %323, %322 : vector<8x128xf32>
    %cst_77 = arith.constant 5.000000e-01 : f32
    %325 = vector.broadcast %cst_77 : f32 to vector<8x128xf32>
    %326 = arith.addf %324, %325 : vector<8x128xf32>
    %327 = vector.extract_strided_slice %326 {offsets = [0, 0], sizes = [8, 32], strides = [1, 1]} : vector<8x128xf32> to vector<8x32xf32>
    %328 = vector.extract_strided_slice %326 {offsets = [0, 32], sizes = [8, 32], strides = [1, 1]} : vector<8x128xf32> to vector<8x32xf32>
    %329 = vector.extract_strided_slice %326 {offsets = [0, 64], sizes = [8, 32], strides = [1, 1]} : vector<8x128xf32> to vector<8x32xf32>
    %330 = vector.extract_strided_slice %322 {offsets = [0, 96], sizes = [8, 32], strides = [1, 1]} : vector<8x128xf32> to vector<8x32xf32>
    %331 = arith.mulf %328, %312 : vector<8x32xf32>
    %332 = arith.mulf %327, %330 : vector<8x32xf32>
    %333 = arith.addf %331, %332 : vector<8x32xf32>
    %334 = math.tanh %333 : vector<8x32xf32>
    %335 = arith.mulf %329, %334 : vector<8x32xf32>
    %336 = arith.truncf %335 : vector<8x32xf32> to vector<8x32xbf16>
    %c0_78 = arith.constant 0 : index
    %c0_79 = arith.constant 0 : index
    %337 = vector.load %arg6[%c0_78, %c0_79] : memref<32x18xbf16, #tpu.memory_space<vmem>>, vector<32x18xbf16>
    %cst_80 = arith.constant dense<0.000000e+00> : vector<8x18xf32>
    %338 = tpu.matmul %336, %337, %cst_80 {dimension_numbers = #tpu.dot_dimension_numbers<[1], [0], [0], [1], [0, 0, 1, 1], [], []>} : vector<8x32xbf16>, vector<32x18xbf16>, vector<8x18xf32> -> vector<8x18xf32>
    %c0_81 = arith.constant 0 : index
    %c0_82 = arith.constant 0 : index
    %339 = vector.load %arg7[%c0_81, %c0_82] : memref<1x18xf32, #tpu.memory_space<vmem>>, vector<1x18xf32>
    %340 = vector.broadcast %339 : vector<1x18xf32> to vector<8x18xf32>
    %341 = arith.addf %338, %340 : vector<8x18xf32>
    %c0_83 = arith.constant 0 : index
    %c0_84 = arith.constant 0 : index
    %342 = vector.load %arg8[%c0_83, %c0_84] : memref<8x18xf32, #tpu.memory_space<vmem>>, vector<8x18xf32>
    tpu.vector_store %arg8[%c0_83, %c0_84], %341 {strides = array<i32>} : memref<8x18xf32, #tpu.memory_space<vmem>>, vector<8x18xf32>,
    return
  }
}

</mosaic_0001>

<bundles_post_ra>
// kernel: net_forward.1
= control target key start
LH: loop header
LB: loop body
LE: loop exit
PB: predicated region body
PF: predicated region fallthrough
CT: control target
= control target key end

     0   :  { %vm73_vm0 = vcmask 130048   ;;  %v1641_v16 = vmov 0   ;;  %v1642_v21 = vmov 0.0   ;;  %vm219_vm1 = vcmask 261120   ;;  %s1981_s1 = inlined_call_operand.vmem [shape: bf16[16,128], index: 1, kind: input, shape index: {}]   ;;  %s1982_s0 = inlined_call_operand.vmem [shape: bf16[64,16], index: 0, kind: input, shape index: {}]   ;;  %s1983_s3 = inlined_call_operand.vmem [shape: f32[1,128], index: 3, kind: input, shape index: {}]   ;;  %s1984_s2 = inlined_call_operand.vmem [shape: bf16[32,256], index: 2, kind: input, shape index: {}]   ;;  %s1985_s4 = inlined_call_operand.vmem [shape: bf16[32,128], index: 4, kind: input, shape index: {}]   ;;  %s1986_s5 = inlined_call_operand.vmem [shape: f32[1,128], index: 5, kind: input, shape index: {}]   ;;  %s1987_s6 = inlined_call_operand.vmem [shape: bf16[32,18], index: 6, kind: input, shape index: {}]   ;;  %s1988_s7 = inlined_call_operand.vmem [shape: f32[1,18], index: 7, kind: input, shape index: {}]   ;;  %s1989_s8 = inlined_call_operand.vmem [shape: f32[8,18], index: 8, kind: output, shape index: {}]  }
   0x1   :  { %v1561_v0 = vld [vmem:[%s1981_s1] sm:$0xff]   ;;  %v1563_v2 = vld [vmem:[%s1982_s0 + $0x8] sm:$0xff]   ;;  %s1640_s1 = smov 32   ;;  %v1717_v15 = vld [vmem:[%s1984_s2 + $0x14] ss:$8 sps:$4 sm:$0xff]   ;;  %255 = vmatprep.mubr.bf16.mxu1 %v1641_v16  ;;  %vm1644_vm2 = vmmov 0  }
   0x2   :  { %v1562_v1 = vld [vmem:[%s1982_s0] sm:$0xff]   ;;  %1466 = vmatprep.subr.bf16.mxu0 %v1561_v0  ;;  %v1723_v17 = vld [vmem:[%s1984_s2 + $0x10] ss:$8 sps:$4 sm:$0xff]   ;;  %235 = vmatprep.subr.bf16.mxu1 %v1717_v15  ;;  %v1750_v25 = vld [vmem:[%s1985_s4 + $0x8] sm:$0xff]   ;;  %vm1389_vm3 = vcmask 146432  }
   0x3   :  { %1467 = vmatpush3.bf16.msra.mxu0 %v1561_v0  ;;  %1468 = vmatprep.mubr.msk.bf16.mxu0 %vm73_vm0, %v1562_v1  ;;  %v1706_v4 = vld [vmem:[%s1983_s3] ss:$0 sm:$0xff]  ;;  %v1729_v18 = vld [vmem:[%s1984_s2 + $0x4] ss:$8 sps:$4 sm:$0xff]   ;;  %v1572_v60 = vld [vmem:[%s1982_s0 + $0x10] sm:$0xff]  }
   0x4   :  { %384 = vmatprep.subr.bf16.mxu0 %v1717_v15  ;;  %236 = vmatpush1.bf16.msra.mxu1 %v1723_v17  ;;  %v1736_v19 = vld [vmem:[%s1984_s2] ss:$8 sps:$4 sm:$0xff]   ;;  %s1643_s2 = smov 64   ;;  %v1573_v61 = vld [vmem:[%s1982_s0 + $0x18] sm:$0xff]  }
   0x5   :  { %237 = vmatprep.subr.bf16.mxu1 %v1729_v18  ;;  %v1757_v27 = vld [vmem:[%s1985_s4] sm:$0xff]  }
   0x6   :  { %1469 = vmatmul.mubr.msk.bf16.vlgmr.msra.gmra.mxu0 %vm73_vm0, %v1563_v2  ;;  %v1777_v36 = vld [vmem:[%s1986_s5] ss:$0 sm:$0xff] }
   0x7   :  { %385 = vmatpush1.bf16.msra.mxu0 %v1723_v17  ;;  %1472 = vmatprep.mubr.msk.bf16.mxu0 %vm73_vm0, %v1572_v60 }
   0x8   :  { %386 = vmatprep.subr.bf16.mxu0 %v1729_v18  ;;  %238 = vmatpush1.bf16.msra.mxu1 %v1736_v19 }
   0x9   :  { %1476 = vmatprep.subr.bf16.mxu1 %v1642_v21 }
   0xb   :  { %387 = vmatpush1.bf16.msra.mxu0 %v1736_v19 }
   0xc   :  { %524 = vmatprep.subr.bf16.mxu0 %v1717_v15 }
   0xe   :  { %1473 = vmatmul.mubr.msk.bf16.gmra.mxu0 %vm73_vm0, %v1573_v61 }
   0xf   :  { %404 = vmatprep.mubr.bf16.mxu0 %v1641_v16 }
  0xc6   :  { %v1701_v3 = vpop.f32.mrf.mxu0 }
  0xc8   :  { %v120_v5 = vpop.f32.mrf.mxu0 }
  0xc9   :  { %v121_v6 = vadd.f32 %v1706_v4, %v120_v5 }
  0xca   :  { %v1771_v28 = vpop.f32.mrf.mxu0 }
  0xcb   :  { %1576 = vtanh.f32 %v121_v6  ;;  %v132_v60 = vadd.f32 %v1771_v28, %v1706_v4 }
  0xcc   :  { %v123_v29 = vpop.f32.mrf.mxu0 }
  0xcd   :  { %v124_v30 = vadd.f32 %v1706_v4, %v123_v29 }
  0xd8   :  { %v1577_v7 = vpop.eup %1576 }
  0xd9   :  { %180 = vrot.lane.b32.xlu0 %v1577_v7, %s1640_s1  ;;  %v176_v8 = vmul.f32 0.5, %v1577_v7 }
  0xdb   :  { %v177_v9 = vadd.f32 0.5, %v176_v8 }
  0xdd   :  { %v178_v12 = vmul.f32 0.0, %v177_v9 }
 0x14b   :  { %v181_v10 = vpop.permute.xlu0 %180 }
 0x14c   :  { %v183_v11 = vmul.f32 %v181_v10, %v177_v9 }
 0x14e   :  { %185 = vrot.lane.b32.xlu0 %v183_v11, %s1640_s1 }
 0x1c0   :  { %v186_v13 = vpop.permute.xlu0 %185 }
 0x1c1   :  { %v1711_v14 = vadd.f32 %v186_v13, %v178_v12  ;;  %v129_v13 = vadd.f32 %v1701_v3, %v1706_v4 }
 0x1c3   :  { %1578 = vtanh.f32 %v1711_v14 }
 0x1d0   :  { %v1579_v20 = vpop.eup %1578 }
 0x1d1   :  { %191 = vrot.lane.b32.xlu1 %v1579_v20, %s1640_s1 }
 0x243   :  { %v192_v22 = vpop.permute.xlu1 %191 }
 0x244   :  { %v194_v23 = vmul.f32 %v192_v22, %v177_v9  ;;  %v1817_v9 = vpop.f32.mrf.mxu0 }
 0x246   :  { %v195_v24 = vpack.c.bf16 %v194_v23, %v194_v23  ;;  %v1819_v10 = vpop.f32.mrf.mxu0 }
 0x248   :  { %197 = vrot.lane.b32.xlu1 %v195_v24, %s1643_s2  ;;  %v1821_v11 = vpop.f32.mrf.mxu0 }
 0x24a   :  { %v1823_v12 = vpop.f32.mrf.mxu0 }
 0x2ba   :  { %v198_v26 = vpop.permute.xlu1 %197 }
 0x2bb   :  { %1410 = vmatmul.mubr.msk.bf16.vlgmr.msra.gmra.mxu1 %vm219_vm1, %v198_v26 }
 0x2bc   :  { %1477 = vmatpush3.bf16.msra.mxu1 %v1750_v25  ;;  %1480 = vmatprep.mubr.msk.bf16.mxu1 %vm1644_vm2, %v1642_v21 }
 0x2bd   :  { %1478 = vmatprep.subr.bf16.mxu1 %v1642_v21 }
 0x2c0   :  { %1479 = vmatpush3.bf16.msra.mxu1 %v1757_v27 }
 0x2c1   :  { %1484 = vmatprep.subr.bf16.mxu1 %v1642_v21 }
 0x2c3   :  { %1481 = vmatmul.mubr.bf16.vlgmr.msra.gmra.mxu1 %v1641_v16 }
 0x2c4   :  { %1485 = vmatpush3.bf16.msra.mxu1 %v1750_v25  ;;  %1488 = vmatprep.mubr.msk.bf16.mxu1 %vm1644_vm2, %v1642_v21 }
 0x2c5   :  { %1486 = vmatprep.subr.bf16.mxu1 %v1642_v21 }
 0x2c8   :  { %1487 = vmatpush3.bf16.msra.mxu1 %v1757_v27 }
 0x2c9   :  { %1492 = vmatprep.subr.bf16.mxu1 %v1642_v21 }
 0x37b   :  { %v257_v31 = vpop.f32.mrf.mxu1 }
 0x37c   :  { %v266_v32 = vadd.f32 %v257_v31, %v124_v30 }
 0x37d   :  { %v259_v33 = vpop.f32.mrf.mxu1 }
 0x37e   :  { %1580 = vtanh.f32 %v266_v32 }
 0x37f   :  { %v261_v34 = vpop.f32.mrf.mxu1 }
 0x381   :  { %v262_v35 = vpop.f32.mrf.mxu1 }
 0x383   :  { %v316_v37 = vpop.f32.mrf.mxu1 }
 0x384   :  { %v322_v38 = vadd.f32 %v316_v37, %v259_v33 }
 0x385   :  { %v1482_v39 = vpop.f32.mrf.mxu1 }
 0x386   :  { %v323_v40 = vadd.f32 %v1777_v36, %v322_v38 }
 0x387   :  { %v319_v41 = vpop.f32.mrf.mxu1 }
 0x388   :  { %1582 = vtanh.f32 %v323_v40 }
 0x389   :  { %v1483_v42 = vpop.f32.mrf.mxu1 }
 0x38b   :  { %v1581_v43 = vpop.eup %1580 }
 0x38c   :  { %329 = vrot.lane.b32.xlu0 %v1581_v43, %s1640_s1  ;;  %v325_v45 = vmul.f32 0.5, %v1581_v43 }
 0x38e   :  { %v326_v46 = vadd.f32 0.5, %v325_v45 }
 0x390   :  { %v327_v53 = vmul.f32 %v326_v46, %v1711_v14 }
 0x395   :  { %v1583_v44 = vpop.eup %1582 }
 0x396   :  { %349 = vrot.lane.b32.xlu1 %v1583_v44, %s1640_s1  ;;  %v345_v49 = vmul.f32 0.5, %v1583_v44 }
 0x398   :  { %v346_v50 = vadd.f32 0.5, %v345_v49 }
 0x39a   :  { %v347_v56 = vmul.f32 0.0, %v346_v50 }
 0x3fe   :  { %v330_v47 = vpop.permute.xlu0 %329 }
 0x3ff   :  { %v332_v48 = vmul.f32 %v330_v47, %v326_v46 }
 0x401   :  { %334 = vrot.lane.b32.xlu0 %v332_v48, %s1640_s1 }
 0x408   :  { %v350_v51 = vpop.permute.xlu1 %349 }
 0x409   :  { %v352_v52 = vmul.f32 %v350_v51, %v346_v50 }
 0x40b   :  { %354 = vrot.lane.b32.xlu1 %v352_v52, %s1640_s1 }
 0x473   :  { %v335_v54 = vpop.permute.xlu0 %334 }
 0x474   :  { %v1785_v55 = vadd.f32 %v335_v54, %v327_v53 }
 0x476   :  { %1584 = vtanh.f32 %v1785_v55 }
 0x47d   :  { %v355_v57 = vpop.permute.xlu1 %354 }
 0x47e   :  { %v1788_v58 = vadd.f32 %v355_v57, %v347_v56 }
 0x480   :  { %1586 = vtanh.f32 %v1788_v58 }
 0x483   :  { %v1585_v59 = vpop.eup %1584 }
 0x484   :  { %340 = vrot.lane.b32.xlu0 %v1585_v59, %s1640_s1 }
 0x48d   :  { %v1587_v62 = vpop.eup %1586 }
 0x48e   :  { %360 = vrot.lane.b32.xlu1 %v1587_v62, %s1640_s1 }
 0x4f6   :  { %v341_v63 = vpop.permute.xlu0 %340 }
 0x4f7   :  { %v343_v0 = vmul.f32 %v341_v63, %v326_v46 }
 0x4f9   :  { %v364_v1 = vpack.c.bf16 %v343_v0, %v343_v0 }
 0x4fb   :  { %367 = vrot.lane.b32.xlu0 %v364_v1, %s1643_s2 }
 0x500   :  { %v361_v2 = vpop.permute.xlu1 %360 }
 0x501   :  { %v363_v5 = vmul.f32 %v361_v2, %v346_v50 }
 0x503   :  { %v365_v6 = vpack.c.bf16 %v363_v5, %v363_v5 }
 0x505   :  { %417 = vrot.lane.b32.xlu1 %v365_v6, %s1643_s2 }
 0x56d   :  { %v368_v7 = vpop.permute.xlu0 %367 }
 0x56e   :  { %1413 = vmatmul.mubr.msk.bf16.vlgmr.msra.gmra.mxu0 %vm219_vm1, %v368_v7 }
 0x56f   :  { %525 = vmatpush1.bf16.msra.mxu0 %v1723_v17  ;;  %544 = vmatprep.mubr.bf16.mxu0 %v1641_v16 }
 0x570   :  { %526 = vmatprep.subr.bf16.mxu0 %v1729_v18 }
 0x573   :  { %527 = vmatpush1.bf16.msra.mxu0 %v1736_v19 }
 0x574   :  { %664 = vmatprep.subr.bf16.mxu0 %v1717_v15 }
 0x577   :  { %v418_v8 = vpop.permute.xlu1 %417 }
 0x578   :  { %1489 = vmatmul.mubr.msk.bf16.vlgmr.msra.gmra.mxu1 %vm219_vm1, %v418_v8 }
 0x579   :  { %1493 = vmatpush3.bf16.msra.mxu1 %v1750_v25  ;;  %1496 = vmatprep.mubr.msk.bf16.mxu1 %vm1644_vm2, %v1642_v21 }
 0x57a   :  { %1494 = vmatprep.subr.bf16.mxu1 %v1642_v21 }
 0x57d   :  { %1495 = vmatpush3.bf16.msra.mxu1 %v1757_v27 }
 0x57e   :  { %1500 = vmatprep.subr.bf16.mxu1 %v1642_v21 }
 0x62e   :  { %v406_v14 = vpop.f32.mrf.mxu0 }
 0x62f   :  { %v415_v20 = vadd.f32 %v406_v14, %v129_v13 }
 0x630   :  { %v408_v22 = vpop.f32.mrf.mxu0 }
 0x631   :  { %1588 = vtanh.f32 %v415_v20 }
 0x632   :  { %v410_v23 = vpop.f32.mrf.mxu0 }
 0x634   :  { %v411_v24 = vpop.f32.mrf.mxu0 }
 0x638   :  { %v456_v26 = vpop.f32.mrf.mxu1 }
 0x639   :  { %v462_v29 = vadd.f32 %v456_v26, %v408_v22 }
 0x63a   :  { %v1490_v30 = vpop.f32.mrf.mxu1 }
 0x63b   :  { %v463_v31 = vadd.f32 %v1777_v36, %v462_v29 }
 0x63c   :  { %v459_v32 = vpop.f32.mrf.mxu1 }
 0x63d   :  { %1590 = vtanh.f32 %v463_v31 }
 0x63e   :  { %v1589_v33 = vpop.eup %1588  ;;  %v1491_v34 = vpop.f32.mrf.mxu1 }
 0x63f   :  { %469 = vrot.lane.b32.xlu0 %v1589_v33, %s1640_s1  ;;  %v465_v3 = vmul.f32 0.5, %v1589_v33 }
 0x641   :  { %v466_v37 = vadd.f32 0.5, %v465_v3 }
 0x643   :  { %v467_v44 = vmul.f32 %v466_v37, %v1785_v55 }
 0x64a   :  { %v1591_v35 = vpop.eup %1590 }
 0x64b   :  { %489 = vrot.lane.b32.xlu1 %v1591_v35, %s1640_s1  ;;  %v485_v40 = vmul.f32 0.5, %v1591_v35 }
 0x64d   :  { %v486_v41 = vadd.f32 0.5, %v485_v40 }
 0x64f   :  { %v487_v47 = vmul.f32 %v486_v41, %v1788_v58 }
 0x6b1   :  { %v470_v38 = vpop.permute.xlu0 %469 }
 0x6b2   :  { %v472_v39 = vmul.f32 %v470_v38, %v466_v37 }
 0x6b4   :  { %474 = vrot.lane.b32.xlu0 %v472_v39, %s1640_s1 }
 0x6bd   :  { %v490_v42 = vpop.permute.xlu1 %489 }
 0x6be   :  { %v492_v43 = vmul.f32 %v490_v42, %v486_v41 }
 0x6c0   :  { %494 = vrot.lane.b32.xlu1 %v492_v43, %s1640_s1 }
 0x726   :  { %v475_v45 = vpop.permute.xlu0 %474 }
 0x727   :  { %v477_v46 = vadd.f32 %v475_v45, %v467_v44 }
 0x729   :  { %1592 = vtanh.f32 %v477_v46 }
 0x732   :  { %v495_v48 = vpop.permute.xlu1 %494 }
 0x733   :  { %v497_v49 = vadd.f32 %v495_v48, %v487_v47  ;;  %v137_v48 = vadd.f32 %v1706_v4, %v1819_v10 }
 0x735   :  { %1594 = vtanh.f32 %v497_v49 }
 0x736   :  { %v1593_v50 = vpop.eup %1592 }
 0x737   :  { %480 = vrot.lane.b32.xlu0 %v1593_v50, %s1640_s1 }
 0x742   :  { %v1595_v51 = vpop.eup %1594 }
 0x743   :  { %500 = vrot.lane.b32.xlu1 %v1595_v51, %s1640_s1 }
 0x7a9   :  { %v481_v52 = vpop.permute.xlu0 %480 }
 0x7aa   :  { %v483_v53 = vmul.f32 %v481_v52, %v466_v37 }
 0x7ac   :  { %v504_v54 = vpack.c.bf16 %v483_v53, %v483_v53 }
 0x7ae   :  { %507 = vrot.lane.b32.xlu0 %v504_v54, %s1643_s2 }
 0x7b5   :  { %v501_v55 = vpop.permute.xlu1 %500 }
 0x7b6   :  { %v503_v56 = vmul.f32 %v501_v55, %v486_v41 }
 0x7b8   :  { %v505_v57 = vpack.c.bf16 %v503_v56, %v503_v56 }
 0x7ba   :  { %557 = vrot.lane.b32.xlu1 %v505_v57, %s1643_s2 }
 0x820   :  { %v508_v58 = vpop.permute.xlu0 %507 }
 0x821   :  { %1415 = vmatmul.mubr.msk.bf16.vlgmr.msra.gmra.mxu0 %vm219_vm1, %v508_v58 }
 0x822   :  { %665 = vmatpush1.bf16.msra.mxu0 %v1723_v17  ;;  %684 = vmatprep.mubr.bf16.mxu0 %v1641_v16 }
 0x823   :  { %666 = vmatprep.subr.bf16.mxu0 %v1729_v18 }
 0x826   :  { %667 = vmatpush1.bf16.msra.mxu0 %v1736_v19 }
 0x827   :  { %804 = vmatprep.subr.bf16.mxu0 %v1717_v15 }
 0x82c   :  { %v558_v59 = vpop.permute.xlu1 %557 }
 0x82d   :  { %1497 = vmatmul.mubr.msk.bf16.vlgmr.msra.gmra.mxu1 %vm219_vm1, %v558_v59 }
 0x82e   :  { %1501 = vmatpush3.bf16.msra.mxu1 %v1750_v25  ;;  %1504 = vmatprep.mubr.msk.bf16.mxu1 %vm1644_vm2, %v1642_v21 }
 0x82f   :  { %1502 = vmatprep.subr.bf16.mxu1 %v1642_v21 }
 0x832   :  { %1503 = vmatpush3.bf16.msra.mxu1 %v1757_v27 }
 0x833   :  { %1508 = vmatprep.subr.bf16.mxu1 %v1642_v21 }
 0x8e1   :  { %v546_v61 = vpop.f32.mrf.mxu0 }
 0x8e2   :  { %v555_v62 = vadd.f32 %v546_v61, %v132_v60 }
 0x8e3   :  { %v548_v63 = vpop.f32.mrf.mxu0 }
 0x8e4   :  { %1596 = vtanh.f32 %v555_v62 }
 0x8e5   :  { %v550_v0 = vpop.f32.mrf.mxu0 }
 0x8e7   :  { %v551_v1 = vpop.f32.mrf.mxu0 }
 0x8ed   :  { %v596_v2 = vpop.f32.mrf.mxu1 }
 0x8ee   :  { %v602_v5 = vadd.f32 %v596_v2, %v548_v63 }
 0x8ef   :  { %v1498_v6 = vpop.f32.mrf.mxu1 }
 0x8f0   :  { %v603_v7 = vadd.f32 %v1777_v36, %v602_v5 }
 0x8f1   :  { %v1597_v8 = vpop.eup %1596  ;;  %v599_v13 = vpop.f32.mrf.mxu1 }
 0x8f2   :  { %1598 = vtanh.f32 %v603_v7  ;;  %609 = vrot.lane.b32.xlu0 %v1597_v8, %s1640_s1  ;;  %v605_v28 = vmul.f32 0.5, %v1597_v8 }
 0x8f3   :  { %v1499_v14 = vpop.f32.mrf.mxu1 }
 0x8f4   :  { %v606_v22 = vadd.f32 0.5, %v605_v28 }
 0x8f6   :  { %v607_v32 = vmul.f32 %v606_v22, %v477_v46 }
 0x8ff   :  { %v1599_v20 = vpop.eup %1598 }
 0x900   :  { %629 = vrot.lane.b32.xlu1 %v1599_v20, %s1640_s1  ;;  %v625_v26 = vmul.f32 0.5, %v1599_v20 }
 0x902   :  { %v626_v29 = vadd.f32 0.5, %v625_v26 }
 0x904   :  { %v627_v35 = vmul.f32 %v626_v29, %v497_v49 }
 0x964   :  { %v610_v23 = vpop.permute.xlu0 %609 }
 0x965   :  { %v612_v24 = vmul.f32 %v610_v23, %v606_v22 }
 0x967   :  { %614 = vrot.lane.b32.xlu0 %v612_v24, %s1640_s1 }
 0x972   :  { %v630_v30 = vpop.permute.xlu1 %629 }
 0x973   :  { %v632_v31 = vmul.f32 %v630_v30, %v626_v29 }
 0x975   :  { %634 = vrot.lane.b32.xlu1 %v632_v31, %s1640_s1 }
 0x9d9   :  { %v615_v33 = vpop.permute.xlu0 %614 }
 0x9da   :  { %v617_v34 = vadd.f32 %v615_v33, %v607_v32 }
 0x9dc   :  { %1600 = vtanh.f32 %v617_v34 }
 0x9e7   :  { %v635_v3 = vpop.permute.xlu1 %634 }
 0x9e8   :  { %v637_v37 = vadd.f32 %v635_v3, %v627_v35  ;;  %v140_v35 = vadd.f32 %v1706_v4, %v1823_v12 }
 0x9e9   :  { %v1601_v38 = vpop.eup %1600 }
 0x9ea   :  { %1602 = vtanh.f32 %v637_v37  ;;  %620 = vrot.lane.b32.xlu0 %v1601_v38, %s1640_s1 }
 0x9f7   :  { %v1603_v39 = vpop.eup %1602 }
 0x9f8   :  { %640 = vrot.lane.b32.xlu1 %v1603_v39, %s1640_s1 }
 0xa5c   :  { %v621_v40 = vpop.permute.xlu0 %620 }
 0xa5d   :  { %v623_v41 = vmul.f32 %v621_v40, %v606_v22 }
 0xa5f   :  { %v644_v42 = vpack.c.bf16 %v623_v41, %v623_v41 }
 0xa61   :  { %647 = vrot.lane.b32.xlu0 %v644_v42, %s1643_s2 }
 0xa6a   :  { %v641_v43 = vpop.permute.xlu1 %640 }
 0xa6b   :  { %v643_v44 = vmul.f32 %v641_v43, %v626_v29 }
 0xa6d   :  { %v645_v45 = vpack.c.bf16 %v643_v44, %v643_v44 }
 0xa6f   :  { %697 = vrot.lane.b32.xlu1 %v645_v45, %s1643_s2 }
 0xad3   :  { %v648_v46 = vpop.permute.xlu0 %647 }
 0xad4   :  { %1417 = vmatmul.mubr.msk.bf16.vlgmr.msra.gmra.mxu0 %vm219_vm1, %v648_v46 }
 0xad5   :  { %805 = vmatpush1.bf16.msra.mxu0 %v1723_v17  ;;  %824 = vmatprep.mubr.bf16.mxu0 %v1641_v16 }
 0xad6   :  { %806 = vmatprep.subr.bf16.mxu0 %v1729_v18 }
 0xad9   :  { %807 = vmatpush1.bf16.msra.mxu0 %v1736_v19 }
 0xada   :  { %944 = vmatprep.subr.bf16.mxu0 %v1717_v15 }
 0xae1   :  { %v698_v47 = vpop.permute.xlu1 %697 }
 0xae2   :  { %1505 = vmatmul.mubr.msk.bf16.vlgmr.msra.gmra.mxu1 %vm219_vm1, %v698_v47 }
 0xae3   :  { %1509 = vmatpush3.bf16.msra.mxu1 %v1750_v25  ;;  %1512 = vmatprep.mubr.msk.bf16.mxu1 %vm1644_vm2, %v1642_v21 }
 0xae4   :  { %1510 = vmatprep.subr.bf16.mxu1 %v1642_v21 }
 0xae7   :  { %1511 = vmatpush3.bf16.msra.mxu1 %v1757_v27 }
 0xae8   :  { %1516 = vmatprep.subr.bf16.mxu1 %v1642_v21 }
 0xb94   :  { %v686_v49 = vpop.f32.mrf.mxu0 }
 0xb95   :  { %v695_v50 = vadd.f32 %v686_v49, %v137_v48 }
 0xb96   :  { %v688_v51 = vpop.f32.mrf.mxu0 }
 0xb97   :  { %1604 = vtanh.f32 %v695_v50 }
 0xb98   :  { %v690_v52 = vpop.f32.mrf.mxu0 }
 0xb9a   :  { %v691_v53 = vpop.f32.mrf.mxu0 }
 0xba2   :  { %v736_v54 = vpop.f32.mrf.mxu1 }
 0xba3   :  { %v742_v55 = vadd.f32 %v736_v54, %v688_v51 }
 0xba4   :  { %v1605_v56 = vpop.eup %1604  ;;  %v1506_v57 = vpop.f32.mrf.mxu1 }
 0xba5   :  { %v743_v58 = vadd.f32 %v1777_v36, %v742_v55  ;;  %749 = vrot.lane.b32.xlu0 %v1605_v56, %s1640_s1  ;;  %v745_v10 = vmul.f32 0.5, %v1605_v56 }
 0xba6   :  { %v739_v59 = vpop.f32.mrf.mxu1 }
 0xba7   :  { %1606 = vtanh.f32 %v743_v58  ;;  %v746_v62 = vadd.f32 0.5, %v745_v10 }
 0xba8   :  { %v1507_v60 = vpop.f32.mrf.mxu1 }
 0xba9   :  { %v747_v7 = vmul.f32 %v746_v62, %v617_v34 }
 0xbb4   :  { %v1607_v61 = vpop.eup %1606 }
 0xbb5   :  { %769 = vrot.lane.b32.xlu1 %v1607_v61, %s1640_s1  ;;  %v765_v1 = vmul.f32 0.5, %v1607_v61 }
 0xbb7   :  { %v766_v2 = vadd.f32 0.5, %v765_v1 }
 0xbb9   :  { %v767_v14 = vmul.f32 %v766_v2, %v637_v37 }
 0xc17   :  { %v750_v63 = vpop.permute.xlu0 %749 }
 0xc18   :  { %v752_v0 = vmul.f32 %v750_v63, %v746_v62 }
 0xc1a   :  { %754 = vrot.lane.b32.xlu0 %v752_v0, %s1640_s1 }
 0xc27   :  { %v770_v5 = vpop.permute.xlu1 %769 }
 0xc28   :  { %v772_v6 = vmul.f32 %v770_v5, %v766_v2 }
 0xc2a   :  { %774 = vrot.lane.b32.xlu1 %v772_v6, %s1640_s1 }
 0xc8c   :  { %v755_v8 = vpop.permute.xlu0 %754 }
 0xc8d   :  { %v757_v13 = vadd.f32 %v755_v8, %v747_v7 }
 0xc8f   :  { %1608 = vtanh.f32 %v757_v13 }
 0xc9c   :  { %v1609_v20 = vpop.eup %1608  ;;  %v775_v28 = vpop.permute.xlu1 %774 }
 0xc9d   :  { %v777_v22 = vadd.f32 %v775_v28, %v767_v14  ;;  %760 = vrot.lane.b32.xlu0 %v1609_v20, %s1640_s1 }
 0xc9f   :  { %1610 = vtanh.f32 %v777_v22 }
 0xcac   :  { %v1611_v23 = vpop.eup %1610 }
 0xcad   :  { %780 = vrot.lane.b32.xlu1 %v1611_v23, %s1640_s1 }
 0xd0f   :  { %v761_v24 = vpop.permute.xlu0 %760 }
 0xd10   :  { %v763_v26 = vmul.f32 %v761_v24, %v746_v62 }
 0xd12   :  { %v784_v29 = vpack.c.bf16 %v763_v26, %v763_v26 }
 0xd14   :  { %787 = vrot.lane.b32.xlu0 %v784_v29, %s1643_s2 }
 0xd1f   :  { %v781_v30 = vpop.permute.xlu1 %780 }
 0xd20   :  { %v783_v31 = vmul.f32 %v781_v30, %v766_v2 }
 0xd22   :  { %v785_v32 = vpack.c.bf16 %v783_v31, %v783_v31 }
 0xd24   :  { %837 = vrot.lane.b32.xlu1 %v785_v32, %s1643_s2 }
 0xd86   :  { %v788_v33 = vpop.permute.xlu0 %787 }
 0xd87   :  { %1419 = vmatmul.mubr.msk.bf16.vlgmr.msra.gmra.mxu0 %vm219_vm1, %v788_v33 }
 0xd88   :  { %945 = vmatpush1.bf16.msra.mxu0 %v1723_v17  ;;  %964 = vmatprep.mubr.bf16.mxu0 %v1641_v16 }
 0xd89   :  { %946 = vmatprep.subr.bf16.mxu0 %v1729_v18 }
 0xd8c   :  { %947 = vmatpush1.bf16.msra.mxu0 %v1736_v19 }
 0xd8d   :  { %1084 = vmatprep.subr.bf16.mxu0 %v1717_v15 }
 0xd96   :  { %v838_v34 = vpop.permute.xlu1 %837 }
 0xd97   :  { %1513 = vmatmul.mubr.msk.bf16.vlgmr.msra.gmra.mxu1 %vm219_vm1, %v838_v34 }
 0xd98   :  { %1517 = vmatpush3.bf16.msra.mxu1 %v1750_v25  ;;  %1520 = vmatprep.mubr.msk.bf16.mxu1 %vm1644_vm2, %v1642_v21 }
 0xd99   :  { %1518 = vmatprep.subr.bf16.mxu1 %v1642_v21 }
 0xd9c   :  { %1519 = vmatpush3.bf16.msra.mxu1 %v1757_v27 }
 0xd9d   :  { %1524 = vmatprep.subr.bf16.mxu1 %v1642_v21 }
 0xe47   :  { %v826_v3 = vpop.f32.mrf.mxu0 }
 0xe48   :  { %v835_v37 = vadd.f32 %v826_v3, %v140_v35 }
 0xe49   :  { %v828_v38 = vpop.f32.mrf.mxu0 }
 0xe4a   :  { %1612 = vtanh.f32 %v835_v37 }
 0xe4b   :  { %v830_v39 = vpop.f32.mrf.mxu0 }
 0xe4d   :  { %v831_v40 = vpop.f32.mrf.mxu0 }
 0xe57   :  { %v1613_v41 = vpop.eup %1612  ;;  %v876_v42 = vpop.f32.mrf.mxu1 }
 0xe58   :  { %v882_v43 = vadd.f32 %v876_v42, %v828_v38  ;;  %889 = vrot.lane.b32.xlu0 %v1613_v41, %s1640_s1  ;;  %v885_v12 = vmul.f32 0.5, %v1613_v41 }
 0xe59   :  { %v1514_v44 = vpop.f32.mrf.mxu1 }
 0xe5a   :  { %v883_v45 = vadd.f32 %v1777_v36, %v882_v43  ;;  %v886_v49 = vadd.f32 0.5, %v885_v12 }
 0xe5b   :  { %v879_v46 = vpop.f32.mrf.mxu1 }
 0xe5c   :  { %1614 = vtanh.f32 %v883_v45  ;;  %v887_v56 = vmul.f32 %v886_v49, %v757_v13 }
 0xe5d   :  { %v1515_v47 = vpop.f32.mrf.mxu1 }
 0xe69   :  { %v1615_v48 = vpop.eup %1614 }
 0xe6a   :  { %909 = vrot.lane.b32.xlu1 %v1615_v48, %s1640_s1  ;;  %v905_v52 = vmul.f32 0.5, %v1615_v48 }
 0xe6c   :  { %v906_v53 = vadd.f32 0.5, %v905_v52 }
 0xe6e   :  { %v907_v60 = vmul.f32 %v906_v53, %v777_v22 }
 0xeca   :  { %v890_v50 = vpop.permute.xlu0 %889 }
 0xecb   :  { %v892_v51 = vmul.f32 %v890_v50, %v886_v49 }
 0xecd   :  { %894 = vrot.lane.b32.xlu0 %v892_v51, %s1640_s1 }
 0xedc   :  { %v910_v54 = vpop.permute.xlu1 %909 }
 0xedd   :  { %v912_v55 = vmul.f32 %v910_v54, %v906_v53 }
 0xedf   :  { %914 = vrot.lane.b32.xlu1 %v912_v55, %s1640_s1 }
 0xf3f   :  { %v895_v57 = vpop.permute.xlu0 %894 }
 0xf40   :  { %v897_v58 = vadd.f32 %v895_v57, %v887_v56 }
 0xf42   :  { %1616 = vtanh.f32 %v897_v58 }
 0xf4f   :  { %v1617_v59 = vpop.eup %1616 }
 0xf50   :  { %900 = vrot.lane.b32.xlu0 %v1617_v59, %s1640_s1 }
 0xf51   :  { %v915_v61 = vpop.permute.xlu1 %914 }
 0xf52   :  { %v917_v10 = vadd.f32 %v915_v61, %v907_v60 }
 0xf54   :  { %1618 = vtanh.f32 %v917_v10 }
 0xf61   :  { %v1619_v62 = vpop.eup %1618 }
 0xf62   :  { %920 = vrot.lane.b32.xlu1 %v1619_v62, %s1640_s1 }
 0xfc2   :  { %v901_v63 = vpop.permute.xlu0 %900 }
 0xfc3   :  { %v903_v0 = vmul.f32 %v901_v63, %v886_v49 }
 0xfc5   :  { %v924_v1 = vpack.c.bf16 %v903_v0, %v903_v0 }
 0xfc7   :  { %927 = vrot.lane.b32.xlu0 %v924_v1, %s1643_s2 }
 0xfd4   :  { %v921_v2 = vpop.permute.xlu1 %920 }
 0xfd5   :  { %v923_v5 = vmul.f32 %v921_v2, %v906_v53 }
 0xfd7   :  { %v925_v6 = vpack.c.bf16 %v923_v5, %v923_v5 }
 0xfd9   :  { %977 = vrot.lane.b32.xlu1 %v925_v6, %s1643_s2 }
0x1039   :  { %v928_v7 = vpop.permute.xlu0 %927 }
0x103a   :  { %1421 = vmatmul.mubr.msk.bf16.vlgmr.msra.gmra.mxu0 %vm219_vm1, %v928_v7 }
0x103b   :  { %1085 = vmatpush1.bf16.msra.mxu0 %v1723_v17  ;;  %1104 = vmatprep.mubr.bf16.mxu0 %v1641_v16  ;;  %v145_v16 = vadd.f32 %v1817_v9, %v1706_v4 }
0x103c   :  { %1086 = vmatprep.subr.bf16.mxu0 %v1729_v18 }
0x103f   :  { %1087 = vmatpush1.bf16.msra.mxu0 %v1736_v19 }
0x1040   :  { %1532 = vmatprep.subr.bf16.mxu0 %v1642_v21 }
0x104b   :  { %v978_v8 = vpop.permute.xlu1 %977 }
0x104c   :  { %1521 = vmatmul.mubr.msk.bf16.vlgmr.msra.gmra.mxu1 %vm219_vm1, %v978_v8 }
0x104d   :  { %1525 = vmatpush3.bf16.msra.mxu1 %v1750_v25  ;;  %1528 = vmatprep.mubr.msk.bf16.mxu1 %vm1644_vm2, %v1642_v21 }
0x104e   :  { %1526 = vmatprep.subr.bf16.mxu1 %v1642_v21 }
0x1051   :  { %1527 = vmatpush3.bf16.msra.mxu1 %v1757_v27 }
0x1052   :  { %1540 = vmatprep.subr.bf16.mxu1 %v1642_v21 }
0x10fa   :  { %v966_v17 = vpop.f32.mrf.mxu0 }
0x10fb   :  { %v975_v19 = vadd.f32 %v966_v17, %v145_v16 }
0x10fc   :  { %v968_v13 = vpop.f32.mrf.mxu0 }
0x10fd   :  { %1620 = vtanh.f32 %v975_v19 }
0x10fe   :  { %v970_v14 = vpop.f32.mrf.mxu0 }
0x1100   :  { %v971_v20 = vpop.f32.mrf.mxu0 }
0x110a   :  { %v1621_v28 = vpop.eup %1620 }
0x110b   :  { %1029 = vrot.lane.b32.xlu0 %v1621_v28, %s1640_s1  ;;  %v1025_v9 = vmul.f32 0.5, %v1621_v28 }
0x110c   :  { %v1016_v22 = vpop.f32.mrf.mxu1 }
0x110d   :  { %v1022_v23 = vadd.f32 %v1016_v22, %v968_v13  ;;  %v1026_v32 = vadd.f32 0.5, %v1025_v9 }
0x110e   :  { %v1522_v24 = vpop.f32.mrf.mxu1 }
0x110f   :  { %v1023_v26 = vadd.f32 %v1777_v36, %v1022_v23  ;;  %v1027_v39 = vmul.f32 %v1026_v32, %v897_v58 }
0x1110   :  { %v1019_v29 = vpop.f32.mrf.mxu1 }
0x1111   :  { %1622 = vtanh.f32 %v1023_v26 }
0x1112   :  { %v1523_v30 = vpop.f32.mrf.mxu1 }
0x111e   :  { %v1623_v31 = vpop.eup %1622 }
0x111f   :  { %1049 = vrot.lane.b32.xlu1 %v1623_v31, %s1640_s1  ;;  %v1045_v35 = vmul.f32 0.5, %v1623_v31 }
0x1121   :  { %v1046_v3 = vadd.f32 0.5, %v1045_v35 }
0x1123   :  { %v1047_v43 = vmul.f32 %v1046_v3, %v917_v10 }
0x117d   :  { %v1030_v33 = vpop.permute.xlu0 %1029 }
0x117e   :  { %v1032_v34 = vmul.f32 %v1030_v33, %v1026_v32 }
0x1180   :  { %1034 = vrot.lane.b32.xlu0 %v1032_v34, %s1640_s1 }
0x1191   :  { %v1050_v37 = vpop.permute.xlu1 %1049 }
0x1192   :  { %v1052_v38 = vmul.f32 %v1050_v37, %v1046_v3 }
0x1194   :  { %1054 = vrot.lane.b32.xlu1 %v1052_v38, %s1640_s1 }
0x11f2   :  { %v1035_v40 = vpop.permute.xlu0 %1034 }
0x11f3   :  { %v1037_v41 = vadd.f32 %v1035_v40, %v1027_v39 }
0x11f5   :  { %1624 = vtanh.f32 %v1037_v41 }
0x1202   :  { %v1625_v42 = vpop.eup %1624 }
0x1203   :  { %1040 = vrot.lane.b32.xlu0 %v1625_v42, %s1640_s1 }
0x1206   :  { %v1055_v44 = vpop.permute.xlu1 %1054 }
0x1207   :  { %v1057_v45 = vadd.f32 %v1055_v44, %v1047_v43 }
0x1209   :  { %1626 = vtanh.f32 %v1057_v45 }
0x1216   :  { %v1627_v46 = vpop.eup %1626 }
0x1217   :  { %1060 = vrot.lane.b32.xlu1 %v1627_v46, %s1640_s1 }
0x1275   :  { %v1041_v47 = vpop.permute.xlu0 %1040 }
0x1276   :  { %v1043_v48 = vmul.f32 %v1041_v47, %v1026_v32 }
0x1278   :  { %v1064_v12 = vpack.c.bf16 %v1043_v48, %v1043_v48 }
0x127a   :  { %1067 = vrot.lane.b32.xlu0 %v1064_v12, %s1643_s2  ;;  %v1575_v12 = vld [vmem:[%s1987_s6] sm:$0xff]  }
0x1289   :  { %v1061_v49 = vpop.permute.xlu1 %1060 }
0x128a   :  { %v1063_v50 = vmul.f32 %v1061_v49, %v1046_v3 }
0x128c   :  { %v1065_v51 = vpack.c.bf16 %v1063_v50, %v1063_v50 }
0x128e   :  { %1117 = vrot.lane.b32.xlu1 %v1065_v51, %s1643_s2 }
0x12ec   :  { %v1068_v52 = vpop.permute.xlu0 %1067 }
0x12ed   :  { %1423 = vmatmul.mubr.msk.bf16.vlgmr.msra.gmra.mxu0 %vm219_vm1, %v1068_v52 }
0x12ee   :  { %1533 = vmatpush3.bf16.msra.mxu0 %v1750_v25  ;;  %1536 = vmatprep.mubr.msk.bf16.mxu0 %vm1644_vm2, %v1642_v21  ;;  %v148_v25 = vadd.f32 %v1821_v11, %v1706_v4 }
0x12ef   :  { %1534 = vmatprep.subr.bf16.mxu0 %v1642_v21 }
0x12f2   :  { %1535 = vmatpush3.bf16.msra.mxu0 %v1757_v27 }
0x12f3   :  { %1548 = vmatprep.subr.bf16.mxu0 %v1642_v21 }
0x1300   :  { %v1118_v53 = vpop.permute.xlu1 %1117 }
0x1301   :  { %1529 = vmatmul.mubr.msk.bf16.vlgmr.msra.gmra.mxu1 %vm219_vm1, %v1118_v53 }
0x1302   :  { %1541 = vmatpush3.bf16.msra.mxu1 %v1717_v15  ;;  %1544 = vmatprep.mubr.msk.bf16.mxu1 %vm1644_vm2, %v1642_v21 }
0x1303   :  { %1542 = vmatprep.subr.bf16.mxu1 %v1642_v21 }
0x1306   :  { %1543 = vmatpush3.bf16.msra.mxu1 %v1729_v18 }
0x13ad   :  { %v1106_v54 = vpop.f32.mrf.mxu0 }
0x13ae   :  { %v1115_v55 = vadd.f32 %v1106_v54, %v148_v25  ;;  %v1427_v25 = vld [vmem:[%s1988_s7] ss:$0 sm:$0xff] }
0x13af   :  { %v1108_v27 = vpop.f32.mrf.mxu0 }
0x13b0   :  { %1628 = vtanh.f32 %v1115_v55 }
0x13b1   :  { %v1110_v56 = vpop.f32.mrf.mxu0 }
0x13b3   :  { %v1111_v57 = vpop.f32.mrf.mxu0 }
0x13bd   :  { %v1629_v58 = vpop.eup %1628 }
0x13be   :  { %1169 = vrot.lane.b32.xlu0 %v1629_v58, %s1640_s1  ;;  %v1165_v4 = vmul.f32 0.5, %v1629_v58 }
0x13c0   :  { %v1166_v11 = vadd.f32 0.5, %v1165_v4 }
0x13c1   :  { %v1156_v15 = vpop.f32.mrf.mxu1 }
0x13c2   :  { %v1162_v59 = vadd.f32 %v1156_v15, %v1108_v27  ;;  %v1167_v7 = vmul.f32 %v1166_v11, %v1037_v41 }
0x13c3   :  { %v1530_v60 = vpop.f32.mrf.mxu1 }
0x13c4   :  { %v1163_v61 = vadd.f32 %v1777_v36, %v1162_v59 }
0x13c5   :  { %v1159_v10 = vpop.f32.mrf.mxu1 }
0x13c6   :  { %1630 = vtanh.f32 %v1163_v61 }
0x13c7   :  { %v1531_v18 = vpop.f32.mrf.mxu1 }
0x13d3   :  { %v1631_v62 = vpop.eup %1630 }
0x13d4   :  { %1189 = vrot.lane.b32.xlu1 %v1631_v62, %s1640_s1  ;;  %v1185_v1 = vmul.f32 0.5, %v1631_v62 }
0x13d6   :  { %v1186_v2 = vadd.f32 0.5, %v1185_v1 }
0x13d8   :  { %v1187_v19 = vmul.f32 %v1186_v2, %v1057_v45 }
0x1430   :  { %v1170_v63 = vpop.permute.xlu0 %1169 }
0x1431   :  { %v1172_v0 = vmul.f32 %v1170_v63, %v1166_v11 }
0x1433   :  { %1174 = vrot.lane.b32.xlu0 %v1172_v0, %s1640_s1 }
0x1446   :  { %v1190_v5 = vpop.permute.xlu1 %1189 }
0x1447   :  { %v1192_v6 = vmul.f32 %v1190_v5, %v1186_v2 }
0x1449   :  { %1194 = vrot.lane.b32.xlu1 %v1192_v6, %s1640_s1 }
0x14a5   :  { %v1175_v8 = vpop.permute.xlu0 %1174 }
0x14a6   :  { %v1177_v16 = vadd.f32 %v1175_v8, %v1167_v7 }
0x14a8   :  { %1632 = vtanh.f32 %v1177_v16 }
0x14b5   :  { %v1633_v17 = vpop.eup %1632 }
0x14b6   :  { %1180 = vrot.lane.b32.xlu0 %v1633_v17, %s1640_s1 }
0x14bb   :  { %v1195_v13 = vpop.permute.xlu1 %1194 }
0x14bc   :  { %v1197_v14 = vadd.f32 %v1195_v13, %v1187_v19 }
0x14be   :  { %1634 = vtanh.f32 %v1197_v14 }
0x14cb   :  { %v1635_v20 = vpop.eup %1634 }
0x14cc   :  { %1200 = vrot.lane.b32.xlu1 %v1635_v20, %s1640_s1 }
0x1528   :  { %v1181_v28 = vpop.permute.xlu0 %1180 }
0x1529   :  { %v1183_v22 = vmul.f32 %v1181_v28, %v1166_v11 }
0x152b   :  { %v1204_v23 = vpack.c.bf16 %v1183_v22, %v1183_v22 }
0x152d   :  { %1253 = vrot.lane.b32.xlu1 %v1204_v23, %s1643_s2 }
0x153e   :  { %v1201_v24 = vpop.permute.xlu1 %1200 }
0x153f   :  { %v1203_v26 = vmul.f32 %v1201_v24, %v1186_v2 }
0x1541   :  { %v1205_v29 = vpack.c.bf16 %v1203_v26, %v1203_v26 }
0x1543   :  { %1207 = vrot.lane.b32.xlu0 %v1205_v29, %s1643_s2 }
0x159f   :  { %v1254_v30 = vpop.permute.xlu1 %1253 }
0x15a0   :  { %1545 = vmatmul.mubr.msk.bf16.vlgmr.msra.gmra.mxu1 %vm219_vm1, %v1254_v30 }
0x15b5   :  { %v1208_v31 = vpop.permute.xlu0 %1207 }
0x15b6   :  { %1537 = vmatmul.mubr.msk.bf16.vlgmr.msra.gmra.mxu0 %vm219_vm1, %v1208_v31 }
0x15b7   :  { %1552 = vmatprep.mubr.msk.bf16.mxu0 %vm1644_vm2, %v1642_v21 }
0x1660   :  { %v1292_v9 = vpop.f32.mrf.mxu1 }
0x1662   :  { %v1546_v32 = vpop.f32.mrf.mxu1 }
0x1664   :  { %v1295_v33 = vpop.f32.mrf.mxu1 }
0x1666   :  { %v1547_v34 = vpop.f32.mrf.mxu1 }
0x1676   :  { %v1246_v35 = vpop.f32.mrf.mxu0 }
0x1677   :  { %v1293_v3 = vadd.f32 %v1292_v9, %v1246_v35 }
0x1678   :  { %v1538_v37 = vpop.f32.mrf.mxu0 }
0x1679   :  { %v1298_v38 = vadd.f32 %v1777_v36, %v1293_v3  ;;  %v1574_v36 = vld [vmem:[%s1987_s6 + $0x8] sm:$0xff]  }
0x167a   :  { %v1249_v39 = vpop.f32.mrf.mxu0  ;;  %1549 = vmatpush3.bf16.msra.mxu0 %v1574_v36 }
0x167b   :  { %1636 = vtanh.f32 %v1298_v38  ;;  %1550 = vmatprep.subr.bf16.mxu0 %v1642_v21 }
0x167c   :  { %v1539_v40 = vpop.f32.mrf.mxu0 }
0x167e   :  { %1551 = vmatpush3.bf16.msra.mxu0 %v1575_v12 }
0x1688   :  { %v1637_v41 = vpop.eup %1636 }
0x1689   :  { %1304 = vrot.lane.b32.xlu0 %v1637_v41, %s1640_s1  ;;  %v1300_v42 = vmul.f32 0.5, %v1637_v41 }
0x168b   :  { %v1301_v43 = vadd.f32 0.5, %v1300_v42 }
0x168d   :  { %v1302_v46 = vmul.f32 %v1301_v43, %v1197_v14 }
0x16fb   :  { %v1305_v44 = vpop.permute.xlu0 %1304 }
0x16fc   :  { %v1307_v45 = vmul.f32 %v1305_v44, %v1301_v43 }
0x16fe   :  { %1309 = vrot.lane.b32.xlu1 %v1307_v45, %s1640_s1 }
0x1770   :  { %v1310_v47 = vpop.permute.xlu1 %1309 }
0x1771   :  { %v1312_v48 = vadd.f32 %v1310_v47, %v1302_v46 }
0x1773   :  { %1638 = vtanh.f32 %v1312_v48 }
0x1780   :  { %v1639_v49 = vpop.eup %1638 }
0x1781   :  { %1315 = vrot.lane.b32.xlu0 %v1639_v49, %s1640_s1 }
0x17f3   :  { %v1316_v50 = vpop.permute.xlu0 %1315 }
0x17f4   :  { %v1318_v51 = vmul.f32 %v1316_v50, %v1301_v43 }
0x17f6   :  { %v1319_v52 = vpack.c.bf16 %v1318_v51, %v1318_v51 }
0x17f8   :  { %1332 = vrot.lane.b32.xlu1 %v1319_v52, %s1643_s2 }
0x186a   :  { %v1333_v53 = vpop.permute.xlu1 %1332 }
0x186b   :  { %1553 = vmatmul.mubr.msk.bf16.vlgmr.msra.gmra.mxu0 %vm219_vm1, %v1333_v53 }
0x192b   :  { %v1383_v54 = vpop.f32.mrf.mxu0 }
0x192c   :  { %v1384_v55 = vadd.f32 %v1427_v25, %v1383_v54 }
0x192d   :  { %v1554_v21 = vpop.f32.mrf.mxu0 }
0x192e   :  { %1390 = vst.msk [vmem:[%s1989_s8] sm:$0xff] %vm1389_vm3, %v1384_v55 }
0x192f   :  { %v1386_v27 = vpop.f32.mrf.mxu0 }
0x1931   :  { %v1555_v56 = vpop.f32.mrf.mxu0 }

</bundles_post_ra>
